<compile_context>
chip_gen: v6e
topology: v6e:2x2x1
jax: 0.10.0
libtpu: 0.0.40
codegen_flags: <defaults>
</compile_context>

<pallas_src>
import math
from functools import partial

import jax
import jax.numpy as jnp
from jax.experimental import pallas as pl
from jax.experimental.pallas import tpu as pltpu


# ---------------------------------------------------------------------------
# Tiling helpers
# ---------------------------------------------------------------------------

def _ragged_tile(dim, pref):
    """Tile for a non-reduction axis: the preferred (aligned) size, or the full
    dim when it is smaller.  The grid uses pl.cdiv, so raggedness is fine."""
    return dim if dim <= pref else pref


def _divisor_tile(dim, pref, align):
    """Tile for a reduction axis (must divide exactly): largest multiple of
    `align` that divides `dim` and is <= pref; else the full dim."""
    if dim <= pref:
        return dim
    t = (pref // align) * align
    while t >= align:
        if dim % t == 0:
            return t
        t -= align
    return dim


# ---------------------------------------------------------------------------
# Pallas kernels
# ---------------------------------------------------------------------------

def _linear_kernel(x_ref, w_ref, b_ref, o_ref, acc_ref, *, relu):
    k = pl.program_id(2)

    @pl.when(k == 0)
    def _():
        acc_ref[...] = jnp.zeros_like(acc_ref)

    acc_ref[...] += jnp.dot(x_ref[...].astype(jnp.bfloat16),
                            w_ref[...].astype(jnp.bfloat16),
                            preferred_element_type=jnp.float32)

    @pl.when(k == pl.num_programs(2) - 1)
    def _():
        y = acc_ref[...] + b_ref[...]
        if relu:
            y = jnp.maximum(y, 0.0)
        o_ref[...] = y.astype(o_ref.dtype)


def linear(x2d, w, b, relu=False, *, tm=256, tn=256, tk=512):
    """y = x2d @ w + b (optional relu).  x2d: (M, K), w: (K, N) bf16, b: (N,)."""
    M, K = x2d.shape
    N = w.shape[1]
    tm = _ragged_tile(M, tm)
    tn = _ragged_tile(N, tn)
    tk = _divisor_tile(K, tk, 128)
    grid = (pl.cdiv(M, tm), pl.cdiv(N, tn), K // tk)
    cost = pl.CostEstimate(
        flops=2 * M * K * N, transcendentals=0,
        bytes_accessed=x2d.dtype.itemsize * M * K + 2 * K * N + 4 * (M * N + N))
    return pl.pallas_call(
        partial(_linear_kernel, relu=relu),
        out_shape=jax.ShapeDtypeStruct((M, N), jnp.float32),
        grid=grid,
        in_specs=[
            pl.BlockSpec((tm, tk), lambda i, j, k: (i, k)),
            pl.BlockSpec((tk, tn), lambda i, j, k: (k, j)),
            pl.BlockSpec((1, tn), lambda i, j, k: (0, j)),
        ],
        out_specs=pl.BlockSpec((tm, tn), lambda i, j, k: (i, j)),
        scratch_shapes=[pltpu.VMEM((tm, tn), jnp.float32)],
        compiler_params=pltpu.CompilerParams(
            dimension_semantics=("parallel", "parallel", "arbitrary")),
        cost_estimate=cost,
    )(x2d, w, b.reshape(1, N))


def _ffn_kernel(x_ref, w1_ref, b1_ref, w2_ref, b2_ref, o_ref, acc_ref):
    # For each d_ff chunk: h = relu(x @ W1[:,chunk] + b1[chunk]),
    # then accumulate h @ W2[chunk,:] into the (tm, D) f32 accumulator.
    f = pl.program_id(1)

    @pl.when(f == 0)
    def _():
        acc_ref[...] = jnp.zeros_like(acc_ref)

    h = jnp.dot(x_ref[...].astype(jnp.bfloat16),
                w1_ref[...].astype(jnp.bfloat16),
                preferred_element_type=jnp.float32)
    h = jnp.maximum(h + b1_ref[...], 0.0)
    acc_ref[...] += jnp.dot(h.astype(jnp.bfloat16),
                            w2_ref[...].astype(jnp.bfloat16),
                            preferred_element_type=jnp.float32)

    @pl.when(f == pl.num_programs(1) - 1)
    def _():
        o_ref[...] = (acc_ref[...] + b2_ref[...]).astype(o_ref.dtype)


def feed_forward(p, x, *, tm=128, tf=256):
    B, S, D = x.shape
    M = B * S
    d_ff = p["fc1_w"].shape[1]
    x2d = x.reshape(M, D)
    tm = _ragged_tile(M, tm)
    tf = _divisor_tile(d_ff, tf, 128)     # reduction axis: must divide exactly
    grid = (pl.cdiv(M, tm), d_ff // tf)
    cost = pl.CostEstimate(
        flops=4 * M * D * d_ff, transcendentals=0,
        bytes_accessed=4 * 2 * M * D + 2 * 2 * D * d_ff + 4 * (d_ff + D))
    y = pl.pallas_call(
        _ffn_kernel,
        out_shape=jax.ShapeDtypeStruct((M, D), jnp.float32),
        grid=grid,
        in_specs=[
            pl.BlockSpec((tm, D), lambda i, f: (i, 0)),
            pl.BlockSpec((D, tf), lambda i, f: (0, f)),
            pl.BlockSpec((1, tf), lambda i, f: (0, f)),
            pl.BlockSpec((tf, D), lambda i, f: (f, 0)),
            pl.BlockSpec((1, D), lambda i, f: (0, 0)),
        ],
        out_specs=pl.BlockSpec((tm, D), lambda i, f: (i, 0)),
        scratch_shapes=[pltpu.VMEM((tm, D), jnp.float32)],
        compiler_params=pltpu.CompilerParams(
            dimension_semantics=("parallel", "arbitrary")),
        cost_estimate=cost,
    )(x2d, p["fc1_w"], p["fc1_b"].reshape(1, d_ff),
      p["fc2_w"], p["fc2_b"].reshape(1, D))
    return y.reshape(B, S, D)


def _add_ln_kernel(x_ref, r_ref, g_ref, b_ref, o_ref, *, eps):
    # Residual add + LayerNorm; statistics kept in f32.
    h = x_ref[...] + r_ref[...]
    mu = jnp.mean(h, axis=-1, keepdims=True)
    var = jnp.mean(jnp.square(h - mu), axis=-1, keepdims=True)
    o_ref[...] = ((h - mu) * jax.lax.rsqrt(var + eps)
                  * g_ref[...] + b_ref[...]).astype(o_ref.dtype)


def add_layernorm(x2d, res2d, gamma, beta, eps=1e-5, *, tm=256):
    """LayerNorm(x + res) over rows of (M, D), row-tiled."""
    M, D = x2d.shape
    tm = _ragged_tile(M, tm)
    return pl.pallas_call(
        partial(_add_ln_kernel, eps=eps),
        out_shape=jax.ShapeDtypeStruct((M, D), jnp.float32),
        grid=(pl.cdiv(M, tm),),
        in_specs=[
            pl.BlockSpec((tm, D), lambda i: (i, 0)),
            pl.BlockSpec((tm, D), lambda i: (i, 0)),
            pl.BlockSpec((1, D), lambda i: (0, 0)),
            pl.BlockSpec((1, D), lambda i: (0, 0)),
        ],
        out_specs=pl.BlockSpec((tm, D), lambda i: (i, 0)),
        compiler_params=pltpu.CompilerParams(dimension_semantics=("parallel",)),
    )(x2d, res2d, gamma.reshape(1, D), beta.reshape(1, D))


def _mha_kernel(q_ref, k_ref, v_ref, o_ref, *, scale):
    # One (batch, head) pair per grid step.  Refs are (Sq, dk)/(Sk, dk):
    # a single contiguous matmul per step, full-block (lane-dense) output store,
    # no per-head Python loop, no masked dk-wide slices.
    q = q_ref[...].astype(jnp.bfloat16)
    k = k_ref[...].astype(jnp.bfloat16)
    v = v_ref[...].astype(jnp.bfloat16)
    # scores = q @ k^T (no materialized transpose), scaled in f32
    s = jax.lax.dot_general(q, k, (((1,), (1,)), ((), ())),
                            preferred_element_type=jnp.float32) * scale
    s = s - jnp.max(s, axis=-1, keepdims=True)
    p = jnp.exp(s)
    p = p / jnp.sum(p, axis=-1, keepdims=True)     # exact division (parity)
    o = jnp.dot(p.astype(jnp.bfloat16), v, preferred_element_type=jnp.float32)
    o_ref[...] = o.astype(o_ref.dtype)


def attention_core(Q, K, V, heads):
    """Q: (B, Sq, D), K/V: (B, Sk, D) -> (B, Sq, D) in bf16."""
    B, Sq, D = Q.shape
    Sk = K.shape[1]
    dk = D // heads
    scale = 1.0 / math.sqrt(dk)
    # Head split/transpose is cheap XLA glue around the kernel.
    Qh = Q.reshape(B, Sq, heads, dk).transpose(0, 2, 1, 3)   # (B, H, Sq, dk)
    Kh = K.reshape(B, Sk, heads, dk).transpose(0, 2, 1, 3)
    Vh = V.reshape(B, Sk, heads, dk).transpose(0, 2, 1, 3)
    out = pl.pallas_call(
        partial(_mha_kernel, scale=scale),
        out_shape=jax.ShapeDtypeStruct((B, heads, Sq, dk), jnp.bfloat16),
        grid=(B, heads),
        in_specs=[
            pl.BlockSpec((None, None, Sq, dk), lambda b, h: (b, h, 0, 0)),
            pl.BlockSpec((None, None, Sk, dk), lambda b, h: (b, h, 0, 0)),
            pl.BlockSpec((None, None, Sk, dk), lambda b, h: (b, h, 0, 0)),
        ],
        out_specs=pl.BlockSpec((None, None, Sq, dk), lambda b, h: (b, h, 0, 0)),
        compiler_params=pltpu.CompilerParams(
            dimension_semantics=("parallel", "parallel")),
    )(Qh, Kh, Vh)
    return out.transpose(0, 2, 1, 3).reshape(B, Sq, D)


# ---------------------------------------------------------------------------
# Model modules (glue around the Pallas kernels)
# ---------------------------------------------------------------------------

def multi_head_attention(p, q_in, kv_in, heads, self_attn):
    """q_in: (B, Sq, D), kv_in: (B, Sk, D) -> (B, Sq, D)."""
    B, Sq, D = q_in.shape
    Sk = kv_in.shape[1]

    if self_attn:
        # Fused QKV projection: one (D -> 3D) matmul.
        qkv = linear(q_in.reshape(B * Sq, D), p["wqkv_w"], p["wqkv_b"])
        Q = qkv[:, :D].reshape(B, Sq, D)
        K = qkv[:, D:2 * D].reshape(B, Sq, D)
        V = qkv[:, 2 * D:].reshape(B, Sq, D)
    else:
        Q = linear(q_in.reshape(B * Sq, D), p["wq_w"], p["wq_b"]).reshape(B, Sq, D)
        kv = linear(kv_in.reshape(B * Sk, D), p["wkv_w"], p["wkv_b"])
        K = kv[:, :D].reshape(B, Sk, D)
        V = kv[:, D:].reshape(B, Sk, D)

    O = attention_core(Q, K, V, heads)                         # (B, Sq, D) bf16
    out = linear(O.reshape(B * Sq, D), p["fc_w"], p["fc_b"]).reshape(B, Sq, D)
    return out


def encoder_layer(p, x, heads):
    B, S, D = x.shape
    attn = multi_head_attention(p["attn"], x, x, heads, self_attn=True)
    x = add_layernorm(x.reshape(B * S, D), attn.reshape(B * S, D),
                      p["norm1_g"], p["norm1_b"]).reshape(B, S, D)
    ff = feed_forward(p["ff"], x)
    x = add_layernorm(x.reshape(B * S, D), ff.reshape(B * S, D),
                      p["norm2_g"], p["norm2_b"]).reshape(B, S, D)
    return x


def decoder_layer(p, x, enc_out, heads):
    B, S, D = x.shape
    attn = multi_head_attention(p["self_attn"], x, x, heads, self_attn=True)
    x = add_layernorm(x.reshape(B * S, D), attn.reshape(B * S, D),
                      p["norm1_g"], p["norm1_b"]).reshape(B, S, D)
    cattn = multi_head_attention(p["cross_attn"], x, enc_out, heads, self_attn=False)
    x = add_layernorm(x.reshape(B * S, D), cattn.reshape(B * S, D),
                      p["norm2_g"], p["norm2_b"]).reshape(B, S, D)
    ff = feed_forward(p["ff"], x)
    x = add_layernorm(x.reshape(B * S, D), ff.reshape(B * S, D),
                      p["norm3_g"], p["norm3_b"]).reshape(B, S, D)
    return x


def positional_encoding_table(embed_size, max_len=512):
    # Reproduces the (idiosyncratic) PyTorch reference formula exactly.
    pos = jnp.arange(max_len, dtype=jnp.float32)[:, None]           # (L, 1)
    i_even = jnp.arange(0, embed_size, 2, dtype=jnp.float32)[None]  # (1, D/2)
    pe_sin = jnp.sin(pos / jnp.power(10000.0, 2.0 * i_even / embed_size))
    pe_cos = jnp.cos(pos / jnp.power(10000.0, 2.0 * (i_even + 1.0) / embed_size))
    pe = jnp.stack([pe_sin, pe_cos], axis=-1).reshape(max_len, embed_size)
    return pe


def transformer_forward(params, src, tgt, heads):
    pe = params["pe"]

    # Encoder
    x = jnp.take(params["enc_emb"], src, axis=0)                 # (B, Ss, D)
    x = x + pe[None, : src.shape[1], :]
    for lp in params["enc_layers"]:
        x = encoder_layer(lp, x, heads)
    enc_out = x

    # Decoder
    y = jnp.take(params["dec_emb"], tgt, axis=0)                 # (B, St, D)
    y = y + pe[None, : tgt.shape[1], :]
    for lp in params["dec_layers"]:
        y = decoder_layer(lp, y, enc_out, heads)

    # Output projection
    B, St, D = y.shape
    logits = linear(y.reshape(B * St, D), params["out_w"], params["out_b"])
    return logits.reshape(B, St, params["out_w"].shape[1])


# ---------------------------------------------------------------------------
# Deterministic parameter initialization (matmul weights stored in bf16)
# ---------------------------------------------------------------------------

def _init_linear(key, d_in, d_out):
    kw, _ = jax.random.split(key)
    w = jax.random.normal(kw, (d_in, d_out), jnp.float32) * 0.02
    b = jnp.zeros((d_out,), jnp.float32)
    return w, b


def _bf16(w):
    return w.astype(jnp.bfloat16)


def _init_mha(key, d_model):
    ks = jax.random.split(key, 4)
    wq_w, wq_b = _init_linear(ks[0], d_model, d_model)
    wk_w, wk_b = _init_linear(ks[1], d_model, d_model)
    wv_w, wv_b = _init_linear(ks[2], d_model, d_model)
    fc_w, fc_b = _init_linear(ks[3], d_model, d_model)
    return dict(
        # fused forms (built once at init; avoids runtime concat/slice of weights)
        wqkv_w=_bf16(jnp.concatenate([wq_w, wk_w, wv_w], axis=1)),
        wqkv_b=jnp.concatenate([wq_b, wk_b, wv_b], axis=0),
        wkv_w=_bf16(jnp.concatenate([wk_w, wv_w], axis=1)),
        wkv_b=jnp.concatenate([wk_b, wv_b], axis=0),
        wq_w=_bf16(wq_w), wq_b=wq_b,
        fc_w=_bf16(fc_w), fc_b=fc_b,
    )


def _init_ff(key, d_model, d_ff):
    k1, k2 = jax.random.split(key)
    fc1_w, fc1_b = _init_linear(k1, d_model, d_ff)
    fc2_w, fc2_b = _init_linear(k2, d_ff, d_model)
    return dict(fc1_w=_bf16(fc1_w), fc1_b=fc1_b, fc2_w=_bf16(fc2_w), fc2_b=fc2_b)


def init_params(key, src_vocab, tgt_vocab, d_model, N, heads, d_ff):
    keys = jax.random.split(key, 3 + 2 * N)
    params = {
        "enc_emb": jax.random.normal(keys[0], (src_vocab, d_model), jnp.float32) * 0.02,
        "dec_emb": jax.random.normal(keys[1], (tgt_vocab, d_model), jnp.float32) * 0.02,
        "pe": positional_encoding_table(d_model),
    }
    enc_layers, dec_layers = [], []
    for n in range(N):
        k = keys[2 + n]
        ka, kf = jax.random.split(k)
        enc_layers.append(dict(
            attn=_init_mha(ka, d_model),
            ff=_init_ff(kf, d_model, d_ff),
            norm1_g=jnp.ones((d_model,), jnp.float32),
            norm1_b=jnp.zeros((d_model,), jnp.float32),
            norm2_g=jnp.ones((d_model,), jnp.float32),
            norm2_b=jnp.zeros((d_model,), jnp.float32),
        ))
    for n in range(N):
        k = keys[2 + N + n]
        ka, kb, kf = jax.random.split(k, 3)
        dec_layers.append(dict(
            self_attn=_init_mha(ka, d_model),
            cross_attn=_init_mha(kb, d_model),
            ff=_init_ff(kf, d_model, d_ff),
            norm1_g=jnp.ones((d_model,), jnp.float32),
            norm1_b=jnp.zeros((d_model,), jnp.float32),
            norm2_g=jnp.ones((d_model,), jnp.float32),
            norm2_b=jnp.zeros((d_model,), jnp.float32),
            norm3_g=jnp.ones((d_model,), jnp.float32),
            norm3_b=jnp.zeros((d_model,), jnp.float32),
        ))
    params["enc_layers"] = enc_layers
    params["dec_layers"] = dec_layers
    out_w, out_b = _init_linear(keys[2 + 2 * N], d_model, tgt_vocab)
    params["out_w"] = _bf16(out_w)
    params["out_b"] = out_b
    return params


# ---------------------------------------------------------------------------
# Main
# ---------------------------------------------------------------------------

if __name__ == "__main__":
    # Small config consistent with Transformer(src_vocab, tgt_vocab, d_model, N, heads, d_ff)
    SRC_VOCAB, TGT_VOCAB = 32, 32
    D_MODEL, N_LAYERS, HEADS, D_FF = 32, 2, 4, 64
    B, S_SRC, S_TGT = 2, 8, 8

    key = jax.random.PRNGKey(0)
    kp, ks, kt = jax.random.split(key, 3)
    params = init_params(kp, SRC_VOCAB, TGT_VOCAB, D_MODEL, N_LAYERS, HEADS, D_FF)

    src = jax.random.randint(ks, (B, S_SRC), 1, SRC_VOCAB, dtype=jnp.int32)
    tgt = jax.random.randint(kt, (B, S_TGT), 1, TGT_VOCAB, dtype=jnp.int32)

    fwd = jax.jit(partial(transformer_forward, heads=HEADS))
    out = fwd(params, src, tgt)
    out = jax.block_until_ready(out)

    assert out.shape == (B, S_TGT, TGT_VOCAB)
    assert jnp.all(jnp.isfinite(out))
    print("KERNEL_OK")
</pallas_src>

<mosaic_0001>
module attributes {stable_mosaic.version = 11 : i64} {
  func.func @_linear_kernel(%arg0: i32, %arg1: i32, %arg2: i32, %arg3: memref<16x32xf32, #tpu.memory_space<vmem>>, %arg4: memref<32x96xbf16, #tpu.memory_space<vmem>>, %arg5: memref<1x96xf32, #tpu.memory_space<vmem>>, %arg6: memref<16x96xf32, #tpu.memory_space<vmem>>, %arg7: memref<16x96xf32, #tpu.memory_space<vmem>>) attributes {dimension_semantics = [#tpu.dimension_semantics<parallel>, #tpu.dimension_semantics<parallel>, #tpu.dimension_semantics<arbitrary>], iteration_bounds = array<i64: 1, 1, 1>, scalar_prefetch = 0 : i64, scratch_operands = 1 : i64, tpu.core_type = #tpu.core_type<tc>, window_params = [{transform_indices = @transform_0, window_bounds = array<i64: 16, 32>}, {transform_indices = @transform_1, window_bounds = array<i64: 32, 96>}, {transform_indices = @transform_2, window_bounds = array<i64: 1, 96>}, {transform_indices = @transform_3, window_bounds = array<i64: 16, 96>}]} {
    %c0_i32 = arith.constant 0 : i32
    %0 = arith.cmpi eq, %arg2, %c0_i32 : i32
    %1 = arith.extui %0 : i1 to i32
    %c0_i32_0 = arith.constant 0 : i32
    %2 = arith.cmpi ne, %1, %c0_i32_0 : i32
    scf.if %2 {
      %cst_10 = arith.constant 0.000000e+00 : f32
      %13 = vector.broadcast %cst_10 : f32 to vector<16x96xf32>
      %c0_11 = arith.constant 0 : index
      %c0_12 = arith.constant 0 : index
      %14 = vector.load %arg7[%c0_11, %c0_12] : memref<16x96xf32, #tpu.memory_space<vmem>>, vector<16x96xf32>
      tpu.vector_store %arg7[%c0_11, %c0_12], %13 {strides = array<i32>} : memref<16x96xf32, #tpu.memory_space<vmem>>, vector<16x96xf32>,
    } else {
    }
    %c0 = arith.constant 0 : index
    %c0_1 = arith.constant 0 : index
    %3 = vector.load %arg7[%c0, %c0_1] : memref<16x96xf32, #tpu.memory_space<vmem>>, vector<16x96xf32>
    %c0_2 = arith.constant 0 : index
    %c0_3 = arith.constant 0 : index
    %4 = vector.load %arg3[%c0_2, %c0_3] : memref<16x32xf32, #tpu.memory_space<vmem>>, vector<16x32xf32>
    %5 = arith.truncf %4 : vector<16x32xf32> to vector<16x32xbf16>
    %c0_4 = arith.constant 0 : index
    %c0_5 = arith.constant 0 : index
    %6 = vector.load %arg4[%c0_4, %c0_5] : memref<32x96xbf16, #tpu.memory_space<vmem>>, vector<32x96xbf16>
    %cst = arith.constant dense<0.000000e+00> : vector<16x96xf32>
    %7 = tpu.matmul %5, %6, %cst {dimension_numbers = #tpu.dot_dimension_numbers<[1], [0], [0], [1], [0, 0, 1, 1], [], []>} : vector<16x32xbf16>, vector<32x96xbf16>, vector<16x96xf32> -> vector<16x96xf32>
    %8 = arith.addf %3, %7 : vector<16x96xf32>
    %c0_6 = arith.constant 0 : index
    %c0_7 = arith.constant 0 : index
    %9 = vector.load %arg7[%c0_6, %c0_7] : memref<16x96xf32, #tpu.memory_space<vmem>>, vector<16x96xf32>
    tpu.vector_store %arg7[%c0_6, %c0_7], %8 {strides = array<i32>} : memref<16x96xf32, #tpu.memory_space<vmem>>, vector<16x96xf32>,
    %c0_i32_8 = arith.constant 0 : i32
    %10 = arith.cmpi eq, %arg2, %c0_i32_8 : i32
    %11 = arith.extui %10 : i1 to i32
    %c0_i32_9 = arith.constant 0 : i32
    %12 = arith.cmpi ne, %11, %c0_i32_9 : i32
    scf.if %12 {
      %c0_10 = arith.constant 0 : index
      %c0_11 = arith.constant 0 : index
      %13 = vector.load %arg7[%c0_10, %c0_11] : memref<16x96xf32, #tpu.memory_space<vmem>>, vector<16x96xf32>
      %c0_12 = arith.constant 0 : index
      %c0_13 = arith.constant 0 : index
      %14 = vector.load %arg5[%c0_12, %c0_13] : memref<1x96xf32, #tpu.memory_space<vmem>>, vector<1x96xf32>
      %15 = vector.broadcast %14 : vector<1x96xf32> to vector<16x96xf32>
      %16 = arith.addf %13, %15 : vector<16x96xf32>
      %c0_14 = arith.constant 0 : index
      %c0_15 = arith.constant 0 : index
      %17 = vector.load %arg6[%c0_14, %c0_15] : memref<16x96xf32, #tpu.memory_space<vmem>>, vector<16x96xf32>
      tpu.vector_store %arg6[%c0_14, %c0_15], %16 {strides = array<i32>} : memref<16x96xf32, #tpu.memory_space<vmem>>, vector<16x96xf32>,
    } else {
    }
    return
  }
  func.func @transform_0(%arg0: i32, %arg1: i32, %arg2: i32) -> (i32, i32) {
    %c0_i32 = arith.constant 0 : i32
    return %arg0, %arg2 : i32, i32
  }
  func.func @transform_1(%arg0: i32, %arg1: i32, %arg2: i32) -> (i32, i32) {
    %c0_i32 = arith.constant 0 : i32
    return %arg2, %arg1 : i32, i32
  }
  func.func @transform_2(%arg0: i32, %arg1: i32, %arg2: i32) -> (i32, i32) {
    %c0_i32 = arith.constant 0 : i32
    %c0_i32_0 = arith.constant 0 : i32
    return %c0_i32, %arg1 : i32, i32
  }
  func.func @transform_3(%arg0: i32, %arg1: i32, %arg2: i32) -> (i32, i32) {
    %c0_i32 = arith.constant 0 : i32
    return %arg0, %arg1 : i32, i32
  }
}

module attributes {stable_mosaic.version = 11 : i64} {
  func.func @_linear_kernel(%arg0: i32, %arg1: i32, %arg2: i32, %arg3: memref<16x32xbf16, #tpu.memory_space<vmem>>, %arg4: memref<32x32xbf16, #tpu.memory_space<vmem>>, %arg5: memref<1x32xf32, #tpu.memory_space<vmem>>, %arg6: memref<16x32xf32, #tpu.memory_space<vmem>>, %arg7: memref<16x32xf32, #tpu.memory_space<vmem>>) attributes {dimension_semantics = [#tpu.dimension_semantics<parallel>, #tpu.dimension_semantics<parallel>, #tpu.dimension_semantics<arbitrary>], iteration_bounds = array<i64: 1, 1, 1>, scalar_prefetch = 0 : i64, scratch_operands = 1 : i64, tpu.core_type = #tpu.core_type<tc>, window_params = [{transform_indices = @transform_0, window_bounds = array<i64: 16, 32>}, {transform_indices = @transform_1, window_bounds = array<i64: 32, 32>}, {transform_indices = @transform_2, window_bounds = array<i64: 1, 32>}, {transform_indices = @transform_3, window_bounds = array<i64: 16, 32>}]} {
    %c0_i32 = arith.constant 0 : i32
    %0 = arith.cmpi eq, %arg2, %c0_i32 : i32
    %1 = arith.extui %0 : i1 to i32
    %c0_i32_0 = arith.constant 0 : i32
    %2 = arith.cmpi ne, %1, %c0_i32_0 : i32
    scf.if %2 {
      %cst_10 = arith.constant 0.000000e+00 : f32
      %12 = vector.broadcast %cst_10 : f32 to vector<16x32xf32>
      %c0_11 = arith.constant 0 : index
      %c0_12 = arith.constant 0 : index
      %13 = vector.load %arg7[%c0_11, %c0_12] : memref<16x32xf32, #tpu.memory_space<vmem>>, vector<16x32xf32>
      tpu.vector_store %arg7[%c0_11, %c0_12], %12 {strides = array<i32>} : memref<16x32xf32, #tpu.memory_space<vmem>>, vector<16x32xf32>,
    } else {
    }
    %c0 = arith.constant 0 : index
    %c0_1 = arith.constant 0 : index
    %3 = vector.load %arg7[%c0, %c0_1] : memref<16x32xf32, #tpu.memory_space<vmem>>, vector<16x32xf32>
    %c0_2 = arith.constant 0 : index
    %c0_3 = arith.constant 0 : index
    %4 = vector.load %arg3[%c0_2, %c0_3] : memref<16x32xbf16, #tpu.memory_space<vmem>>, vector<16x32xbf16>
    %c0_4 = arith.constant 0 : index
    %c0_5 = arith.constant 0 : index
    %5 = vector.load %arg4[%c0_4, %c0_5] : memref<32x32xbf16, #tpu.memory_space<vmem>>, vector<32x32xbf16>
    %cst = arith.constant dense<0.000000e+00> : vector<16x32xf32>
    %6 = tpu.matmul %4, %5, %cst {dimension_numbers = #tpu.dot_dimension_numbers<[1], [0], [0], [1], [0, 0, 1, 1], [], []>} : vector<16x32xbf16>, vector<32x32xbf16>, vector<16x32xf32> -> vector<16x32xf32>
    %7 = arith.addf %3, %6 : vector<16x32xf32>
    %c0_6 = arith.constant 0 : index
    %c0_7 = arith.constant 0 : index
    %8 = vector.load %arg7[%c0_6, %c0_7] : memref<16x32xf32, #tpu.memory_space<vmem>>, vector<16x32xf32>
    tpu.vector_store %arg7[%c0_6, %c0_7], %7 {strides = array<i32>} : memref<16x32xf32, #tpu.memory_space<vmem>>, vector<16x32xf32>,
    %c0_i32_8 = arith.constant 0 : i32
    %9 = arith.cmpi eq, %arg2, %c0_i32_8 : i32
    %10 = arith.extui %9 : i1 to i32
    %c0_i32_9 = arith.constant 0 : i32
    %11 = arith.cmpi ne, %10, %c0_i32_9 : i32
    scf.if %11 {
      %c0_10 = arith.constant 0 : index
      %c0_11 = arith.constant 0 : index
      %12 = vector.load %arg7[%c0_10, %c0_11] : memref<16x32xf32, #tpu.memory_space<vmem>>, vector<16x32xf32>
      %c0_12 = arith.constant 0 : index
      %c0_13 = arith.constant 0 : index
      %13 = vector.load %arg5[%c0_12, %c0_13] : memref<1x32xf32, #tpu.memory_space<vmem>>, vector<1x32xf32>
      %14 = vector.broadcast %13 : vector<1x32xf32> to vector<16x32xf32>
      %15 = arith.addf %12, %14 : vector<16x32xf32>
      %c0_14 = arith.constant 0 : index
      %c0_15 = arith.constant 0 : index
      %16 = vector.load %arg6[%c0_14, %c0_15] : memref<16x32xf32, #tpu.memory_space<vmem>>, vector<16x32xf32>
      tpu.vector_store %arg6[%c0_14, %c0_15], %15 {strides = array<i32>} : memref<16x32xf32, #tpu.memory_space<vmem>>, vector<16x32xf32>,
    } else {
    }
    return
  }
  func.func @transform_0(%arg0: i32, %arg1: i32, %arg2: i32) -> (i32, i32) {
    %c0_i32 = arith.constant 0 : i32
    return %arg0, %arg2 : i32, i32
  }
  func.func @transform_1(%arg0: i32, %arg1: i32, %arg2: i32) -> (i32, i32) {
    %c0_i32 = arith.constant 0 : i32
    return %arg2, %arg1 : i32, i32
  }
  func.func @transform_2(%arg0: i32, %arg1: i32, %arg2: i32) -> (i32, i32) {
    %c0_i32 = arith.constant 0 : i32
    %c0_i32_0 = arith.constant 0 : i32
    return %c0_i32, %arg1 : i32, i32
  }
  func.func @transform_3(%arg0: i32, %arg1: i32, %arg2: i32) -> (i32, i32) {
    %c0_i32 = arith.constant 0 : i32
    return %arg0, %arg1 : i32, i32
  }
}

module attributes {stable_mosaic.version = 11 : i64} {
  func.func @_mha_kernel(%arg0: i32, %arg1: i32, %arg2: memref<1x1x8x8xf32, #tpu.memory_space<vmem>>, %arg3: memref<1x1x8x8xf32, #tpu.memory_space<vmem>>, %arg4: memref<1x1x8x8xf32, #tpu.memory_space<vmem>>, %arg5: memref<1x1x8x8xbf16, #tpu.memory_space<vmem>>) attributes {dimension_semantics = [#tpu.dimension_semantics<parallel>, #tpu.dimension_semantics<parallel>], iteration_bounds = array<i64: 2, 4>, scalar_prefetch = 0 : i64, scratch_operands = 0 : i64, tpu.core_type = #tpu.core_type<tc>, window_params = [{transform_indices = @transform_0, window_bounds = array<i64: 1, 1, 8, 8>}, {transform_indices = @transform_1, window_bounds = array<i64: 1, 1, 8, 8>}, {transform_indices = @transform_2, window_bounds = array<i64: 1, 1, 8, 8>}, {transform_indices = @transform_3, window_bounds = array<i64: 1, 1, 8, 8>}]} {
    %c0 = arith.constant 0 : index
    %c0_0 = arith.constant 0 : index
    %c0_1 = arith.constant 0 : index
    %c0_2 = arith.constant 0 : index
    %0 = vector.load %arg2[%c0, %c0_0, %c0_1, %c0_2] : memref<1x1x8x8xf32, #tpu.memory_space<vmem>>, vector<1x1x8x8xf32>
    %1 = vector.shape_cast %0 : vector<1x1x8x8xf32> to vector<8x8xf32>
    %2 = arith.truncf %1 : vector<8x8xf32> to vector<8x8xbf16>
    %c0_3 = arith.constant 0 : index
    %c0_4 = arith.constant 0 : index
    %c0_5 = arith.constant 0 : index
    %c0_6 = arith.constant 0 : index
    %3 = vector.load %arg3[%c0_3, %c0_4, %c0_5, %c0_6] : memref<1x1x8x8xf32, #tpu.memory_space<vmem>>, vector<1x1x8x8xf32>
    %4 = vector.shape_cast %3 : vector<1x1x8x8xf32> to vector<8x8xf32>
    %5 = arith.truncf %4 : vector<8x8xf32> to vector<8x8xbf16>
    %c0_7 = arith.constant 0 : index
    %c0_8 = arith.constant 0 : index
    %c0_9 = arith.constant 0 : index
    %c0_10 = arith.constant 0 : index
    %6 = vector.load %arg4[%c0_7, %c0_8, %c0_9, %c0_10] : memref<1x1x8x8xf32, #tpu.memory_space<vmem>>, vector<1x1x8x8xf32>
    %7 = vector.shape_cast %6 : vector<1x1x8x8xf32> to vector<8x8xf32>
    %8 = arith.truncf %7 : vector<8x8xf32> to vector<8x8xbf16>
    %cst = arith.constant dense<0.000000e+00> : vector<8x8xf32>
    %9 = tpu.matmul %2, %5, %cst {dimension_numbers = #tpu.dot_dimension_numbers<[1], [1], [0], [0], [0, 0, 1, 0], [], []>} : vector<8x8xbf16>, vector<8x8xbf16>, vector<8x8xf32> -> vector<8x8xf32>
    %cst_11 = arith.constant 0.353553385 : f32
    %10 = vector.broadcast %cst_11 : f32 to vector<8x8xf32>
    %11 = arith.mulf %9, %10 : vector<8x8xf32>
    %cst_12 = arith.constant dense<0xFF800000> : vector<8xf32>
    %12 = vector.multi_reduction <maximumf>, %11, %cst_12 [1] : vector<8x8xf32> to vector<8xf32>
    %13 = vector.shape_cast %12 : vector<8xf32> to vector<8x1xf32>
    %14 = vector.broadcast %13 : vector<8x1xf32> to vector<8x8xf32>
    %15 = arith.subf %11, %14 : vector<8x8xf32>
    %16 = math.exp %15 : vector<8x8xf32>
    %cst_13 = arith.constant dense<0.000000e+00> : vector<8xf32>
    %17 = vector.multi_reduction <add>, %16, %cst_13 [1] : vector<8x8xf32> to vector<8xf32>
    %18 = vector.shape_cast %17 : vector<8xf32> to vector<8x1xf32>
    %19 = vector.broadcast %18 : vector<8x1xf32> to vector<8x8xf32>
    %20 = arith.divf %16, %19 : vector<8x8xf32>
    %21 = arith.truncf %20 : vector<8x8xf32> to vector<8x8xbf16>
    %cst_14 = arith.constant dense<0.000000e+00> : vector<8x8xf32>
    %22 = tpu.matmul %21, %8, %cst_14 {dimension_numbers = #tpu.dot_dimension_numbers<[1], [0], [0], [1], [0, 0, 1, 1], [], []>} : vector<8x8xbf16>, vector<8x8xbf16>, vector<8x8xf32> -> vector<8x8xf32>
    %23 = arith.truncf %22 : vector<8x8xf32> to vector<8x8xbf16>
    %c0_15 = arith.constant 0 : index
    %c0_16 = arith.constant 0 : index
    %c0_17 = arith.constant 0 : index
    %c0_18 = arith.constant 0 : index
    %24 = vector.load %arg5[%c0_15, %c0_16, %c0_17, %c0_18] : memref<1x1x8x8xbf16, #tpu.memory_space<vmem>>, vector<1x1x8x8xbf16>
    %25 = vector.shape_cast %24 : vector<1x1x8x8xbf16> to vector<8x8xbf16>
    %26 = vector.shape_cast %23 : vector<8x8xbf16> to vector<1x1x8x8xbf16>
    tpu.vector_store %arg5[%c0_15, %c0_16, %c0_17, %c0_18], %26 {strides = array<i32>} : memref<1x1x8x8xbf16, #tpu.memory_space<vmem>>, vector<1x1x8x8xbf16>,
    return
  }
  func.func @transform_0(%arg0: i32, %arg1: i32) -> (i32, i32, i32, i32) {
    %c0_i32 = arith.constant 0 : i32
    %c0_i32_0 = arith.constant 0 : i32
    %c0_i32_1 = arith.constant 0 : i32
    return %arg0, %arg1, %c0_i32, %c0_i32_0 : i32, i32, i32, i32
  }
  func.func @transform_1(%arg0: i32, %arg1: i32) -> (i32, i32, i32, i32) {
    %c0_i32 = arith.constant 0 : i32
    %c0_i32_0 = arith.constant 0 : i32
    %c0_i32_1 = arith.constant 0 : i32
    return %arg0, %arg1, %c0_i32, %c0_i32_0 : i32, i32, i32, i32
  }
  func.func @transform_2(%arg0: i32, %arg1: i32) -> (i32, i32, i32, i32) {
    %c0_i32 = arith.constant 0 : i32
    %c0_i32_0 = arith.constant 0 : i32
    %c0_i32_1 = arith.constant 0 : i32
    return %arg0, %arg1, %c0_i32, %c0_i32_0 : i32, i32, i32, i32
  }
  func.func @transform_3(%arg0: i32, %arg1: i32) -> (i32, i32, i32, i32) {
    %c0_i32 = arith.constant 0 : i32
    %c0_i32_0 = arith.constant 0 : i32
    %c0_i32_1 = arith.constant 0 : i32
    return %arg0, %arg1, %c0_i32, %c0_i32_0 : i32, i32, i32, i32
  }
}

module attributes {stable_mosaic.version = 11 : i64} {
  func.func @_add_ln_kernel(%arg0: i32, %arg1: memref<16x32xf32, #tpu.memory_space<vmem>>, %arg2: memref<16x32xf32, #tpu.memory_space<vmem>>, %arg3: memref<1x32xf32, #tpu.memory_space<vmem>>, %arg4: memref<1x32xf32, #tpu.memory_space<vmem>>, %arg5: memref<16x32xf32, #tpu.memory_space<vmem>>) attributes {dimension_semantics = [#tpu.dimension_semantics<parallel>], iteration_bounds = array<i64: 1>, scalar_prefetch = 0 : i64, scratch_operands = 0 : i64, tpu.core_type = #tpu.core_type<tc>, window_params = [{transform_indices = @transform_0, window_bounds = array<i64: 16, 32>}, {transform_indices = @transform_1, window_bounds = array<i64: 16, 32>}, {pipeline_mode = #tpu.pipeline_mode<synchronous>, transform_indices = @transform_2, window_bounds = array<i64: 1, 32>}, {pipeline_mode = #tpu.pipeline_mode<synchronous>, transform_indices = @transform_3, window_bounds = array<i64: 1, 32>}, {transform_indices = @transform_4, window_bounds = array<i64: 16, 32>}]} {
    %c0 = arith.constant 0 : index
    %c0_0 = arith.constant 0 : index
    %0 = vector.load %arg1[%c0, %c0_0] : memref<16x32xf32, #tpu.memory_space<vmem>>, vector<16x32xf32>
    %c0_1 = arith.constant 0 : index
    %c0_2 = arith.constant 0 : index
    %1 = vector.load %arg2[%c0_1, %c0_2] : memref<16x32xf32, #tpu.memory_space<vmem>>, vector<16x32xf32>
    %2 = arith.addf %0, %1 : vector<16x32xf32>
    %cst = arith.constant dense<0.000000e+00> : vector<16xf32>
    %3 = vector.multi_reduction <add>, %2, %cst [1] : vector<16x32xf32> to vector<16xf32>
    %4 = vector.shape_cast %3 : vector<16xf32> to vector<16x1xf32>
    %cst_3 = arith.constant 3.200000e+01 : f32
    %5 = vector.broadcast %cst_3 : f32 to vector<16x1xf32>
    %6 = arith.divf %4, %5 : vector<16x1xf32>
    %7 = vector.broadcast %6 : vector<16x1xf32> to vector<16x32xf32>
    %8 = arith.subf %2, %7 : vector<16x32xf32>
    %9 = arith.mulf %8, %8 : vector<16x32xf32>
    %cst_4 = arith.constant dense<0.000000e+00> : vector<16xf32>
    %10 = vector.multi_reduction <add>, %9, %cst_4 [1] : vector<16x32xf32> to vector<16xf32>
    %11 = vector.shape_cast %10 : vector<16xf32> to vector<16x1xf32>
    %cst_5 = arith.constant 3.200000e+01 : f32
    %12 = vector.broadcast %cst_5 : f32 to vector<16x1xf32>
    %13 = arith.divf %11, %12 : vector<16x1xf32>
    %14 = vector.broadcast %6 : vector<16x1xf32> to vector<16x32xf32>
    %15 = arith.subf %2, %14 : vector<16x32xf32>
    %cst_6 = arith.constant 9.99999974E-6 : f32
    %16 = vector.broadcast %cst_6 : f32 to vector<16x1xf32>
    %17 = arith.addf %13, %16 : vector<16x1xf32>
    %18 = math.rsqrt %17 : vector<16x1xf32>
    %19 = vector.broadcast %18 : vector<16x1xf32> to vector<16x32xf32>
    %20 = arith.mulf %15, %19 : vector<16x32xf32>
    %c0_7 = arith.constant 0 : index
    %c0_8 = arith.constant 0 : index
    %21 = vector.load %arg3[%c0_7, %c0_8] : memref<1x32xf32, #tpu.memory_space<vmem>>, vector<1x32xf32>
    %22 = vector.broadcast %21 : vector<1x32xf32> to vector<16x32xf32>
    %23 = arith.mulf %20, %22 : vector<16x32xf32>
    %c0_9 = arith.constant 0 : index
    %c0_10 = arith.constant 0 : index
    %24 = vector.load %arg4[%c0_9, %c0_10] : memref<1x32xf32, #tpu.memory_space<vmem>>, vector<1x32xf32>
    %25 = vector.broadcast %24 : vector<1x32xf32> to vector<16x32xf32>
    %26 = arith.addf %23, %25 : vector<16x32xf32>
    %c0_11 = arith.constant 0 : index
    %c0_12 = arith.constant 0 : index
    %27 = vector.load %arg5[%c0_11, %c0_12] : memref<16x32xf32, #tpu.memory_space<vmem>>, vector<16x32xf32>
    tpu.vector_store %arg5[%c0_11, %c0_12], %26 {strides = array<i32>} : memref<16x32xf32, #tpu.memory_space<vmem>>, vector<16x32xf32>,
    return
  }
  func.func @transform_0(%arg0: i32) -> (i32, i32) {
    %c0_i32 = arith.constant 0 : i32
    %c0_i32_0 = arith.constant 0 : i32
    return %arg0, %c0_i32 : i32, i32
  }
  func.func @transform_1(%arg0: i32) -> (i32, i32) {
    %c0_i32 = arith.constant 0 : i32
    %c0_i32_0 = arith.constant 0 : i32
    return %arg0, %c0_i32 : i32, i32
  }
  func.func @transform_2(%arg0: i32) -> (i32, i32) {
    %c0_i32 = arith.constant 0 : i32
    %c0_i32_0 = arith.constant 0 : i32
    %c0_i32_1 = arith.constant 0 : i32
    return %c0_i32, %c0_i32_0 : i32, i32
  }
  func.func @transform_3(%arg0: i32) -> (i32, i32) {
    %c0_i32 = arith.constant 0 : i32
    %c0_i32_0 = arith.constant 0 : i32
    %c0_i32_1 = arith.constant 0 : i32
    return %c0_i32, %c0_i32_0 : i32, i32
  }
  func.func @transform_4(%arg0: i32) -> (i32, i32) {
    %c0_i32 = arith.constant 0 : i32
    %c0_i32_0 = arith.constant 0 : i32
    return %arg0, %c0_i32 : i32, i32
  }
}

module attributes {stable_mosaic.version = 11 : i64} {
  func.func @_linear_kernel(%arg0: i32, %arg1: i32, %arg2: i32, %arg3: memref<16x32xf32, #tpu.memory_space<vmem>>, %arg4: memref<32x32xbf16, #tpu.memory_space<vmem>>, %arg5: memref<1x32xf32, #tpu.memory_space<vmem>>, %arg6: memref<16x32xf32, #tpu.memory_space<vmem>>, %arg7: memref<16x32xf32, #tpu.memory_space<vmem>>) attributes {dimension_semantics = [#tpu.dimension_semantics<parallel>, #tpu.dimension_semantics<parallel>, #tpu.dimension_semantics<arbitrary>], iteration_bounds = array<i64: 1, 1, 1>, scalar_prefetch = 0 : i64, scratch_operands = 1 : i64, tpu.core_type = #tpu.core_type<tc>, window_params = [{transform_indices = @transform_0, window_bounds = array<i64: 16, 32>}, {transform_indices = @transform_1, window_bounds = array<i64: 32, 32>}, {transform_indices = @transform_2, window_bounds = array<i64: 1, 32>}, {transform_indices = @transform_3, window_bounds = array<i64: 16, 32>}]} {
    %c0_i32 = arith.constant 0 : i32
    %0 = arith.cmpi eq, %arg2, %c0_i32 : i32
    %1 = arith.extui %0 : i1 to i32
    %c0_i32_0 = arith.constant 0 : i32
    %2 = arith.cmpi ne, %1, %c0_i32_0 : i32
    scf.if %2 {
      %cst_10 = arith.constant 0.000000e+00 : f32
      %13 = vector.broadcast %cst_10 : f32 to vector<16x32xf32>
      %c0_11 = arith.constant 0 : index
      %c0_12 = arith.constant 0 : index
      %14 = vector.load %arg7[%c0_11, %c0_12] : memref<16x32xf32, #tpu.memory_space<vmem>>, vector<16x32xf32>
      tpu.vector_store %arg7[%c0_11, %c0_12], %13 {strides = array<i32>} : memref<16x32xf32, #tpu.memory_space<vmem>>, vector<16x32xf32>,
    } else {
    }
    %c0 = arith.constant 0 : index
    %c0_1 = arith.constant 0 : index
    %3 = vector.load %arg7[%c0, %c0_1] : memref<16x32xf32, #tpu.memory_space<vmem>>, vector<16x32xf32>
    %c0_2 = arith.constant 0 : index
    %c0_3 = arith.constant 0 : index
    %4 = vector.load %arg3[%c0_2, %c0_3] : memref<16x32xf32, #tpu.memory_space<vmem>>, vector<16x32xf32>
    %5 = arith.truncf %4 : vector<16x32xf32> to vector<16x32xbf16>
    %c0_4 = arith.constant 0 : index
    %c0_5 = arith.constant 0 : index
    %6 = vector.load %arg4[%c0_4, %c0_5] : memref<32x32xbf16, #tpu.memory_space<vmem>>, vector<32x32xbf16>
    %cst = arith.constant dense<0.000000e+00> : vector<16x32xf32>
    %7 = tpu.matmul %5, %6, %cst {dimension_numbers = #tpu.dot_dimension_numbers<[1], [0], [0], [1], [0, 0, 1, 1], [], []>} : vector<16x32xbf16>, vector<32x32xbf16>, vector<16x32xf32> -> vector<16x32xf32>
    %8 = arith.addf %3, %7 : vector<16x32xf32>
    %c0_6 = arith.constant 0 : index
    %c0_7 = arith.constant 0 : index
    %9 = vector.load %arg7[%c0_6, %c0_7] : memref<16x32xf32, #tpu.memory_space<vmem>>, vector<16x32xf32>
    tpu.vector_store %arg7[%c0_6, %c0_7], %8 {strides = array<i32>} : memref<16x32xf32, #tpu.memory_space<vmem>>, vector<16x32xf32>,
    %c0_i32_8 = arith.constant 0 : i32
    %10 = arith.cmpi eq, %arg2, %c0_i32_8 : i32
    %11 = arith.extui %10 : i1 to i32
    %c0_i32_9 = arith.constant 0 : i32
    %12 = arith.cmpi ne, %11, %c0_i32_9 : i32
    scf.if %12 {
      %c0_10 = arith.constant 0 : index
      %c0_11 = arith.constant 0 : index
      %13 = vector.load %arg7[%c0_10, %c0_11] : memref<16x32xf32, #tpu.memory_space<vmem>>, vector<16x32xf32>
      %c0_12 = arith.constant 0 : index
      %c0_13 = arith.constant 0 : index
      %14 = vector.load %arg5[%c0_12, %c0_13] : memref<1x32xf32, #tpu.memory_space<vmem>>, vector<1x32xf32>
      %15 = vector.broadcast %14 : vector<1x32xf32> to vector<16x32xf32>
      %16 = arith.addf %13, %15 : vector<16x32xf32>
      %c0_14 = arith.constant 0 : index
      %c0_15 = arith.constant 0 : index
      %17 = vector.load %arg6[%c0_14, %c0_15] : memref<16x32xf32, #tpu.memory_space<vmem>>, vector<16x32xf32>
      tpu.vector_store %arg6[%c0_14, %c0_15], %16 {strides = array<i32>} : memref<16x32xf32, #tpu.memory_space<vmem>>, vector<16x32xf32>,
    } else {
    }
    return
  }
  func.func @transform_0(%arg0: i32, %arg1: i32, %arg2: i32) -> (i32, i32) {
    %c0_i32 = arith.constant 0 : i32
    return %arg0, %arg2 : i32, i32
  }
  func.func @transform_1(%arg0: i32, %arg1: i32, %arg2: i32) -> (i32, i32) {
    %c0_i32 = arith.constant 0 : i32
    return %arg2, %arg1 : i32, i32
  }
  func.func @transform_2(%arg0: i32, %arg1: i32, %arg2: i32) -> (i32, i32) {
    %c0_i32 = arith.constant 0 : i32
    %c0_i32_0 = arith.constant 0 : i32
    return %c0_i32, %arg1 : i32, i32
  }
  func.func @transform_3(%arg0: i32, %arg1: i32, %arg2: i32) -> (i32, i32) {
    %c0_i32 = arith.constant 0 : i32
    return %arg0, %arg1 : i32, i32
  }
}

module attributes {stable_mosaic.version = 11 : i64} {
  func.func @_ffn_kernel(%arg0: i32, %arg1: i32, %arg2: memref<16x32xf32, #tpu.memory_space<vmem>>, %arg3: memref<32x64xbf16, #tpu.memory_space<vmem>>, %arg4: memref<1x64xf32, #tpu.memory_space<vmem>>, %arg5: memref<64x32xbf16, #tpu.memory_space<vmem>>, %arg6: memref<1x32xf32, #tpu.memory_space<vmem>>, %arg7: memref<16x32xf32, #tpu.memory_space<vmem>>, %arg8: memref<16x32xf32, #tpu.memory_space<vmem>>) attributes {dimension_semantics = [#tpu.dimension_semantics<parallel>, #tpu.dimension_semantics<arbitrary>], iteration_bounds = array<i64: 1, 1>, scalar_prefetch = 0 : i64, scratch_operands = 1 : i64, tpu.core_type = #tpu.core_type<tc>, window_params = [{transform_indices = @transform_0, window_bounds = array<i64: 16, 32>}, {transform_indices = @transform_1, window_bounds = array<i64: 32, 64>}, {transform_indices = @transform_2, window_bounds = array<i64: 1, 64>}, {transform_indices = @transform_3, window_bounds = array<i64: 64, 32>}, {pipeline_mode = #tpu.pipeline_mode<synchronous>, transform_indices = @transform_4, window_bounds = array<i64: 1, 32>}, {transform_indices = @transform_5, window_bounds = array<i64: 16, 32>}]} {
    %c0_i32 = arith.constant 0 : i32
    %0 = arith.cmpi eq, %arg1, %c0_i32 : i32
    %1 = arith.extui %0 : i1 to i32
    %c0_i32_0 = arith.constant 0 : i32
    %2 = arith.cmpi ne, %1, %c0_i32_0 : i32
    scf.if %2 {
      %cst_16 = arith.constant 0.000000e+00 : f32
      %21 = vector.broadcast %cst_16 : f32 to vector<16x32xf32>
      %c0_17 = arith.constant 0 : index
      %c0_18 = arith.constant 0 : index
      %22 = vector.load %arg8[%c0_17, %c0_18] : memref<16x32xf32, #tpu.memory_space<vmem>>, vector<16x32xf32>
      tpu.vector_store %arg8[%c0_17, %c0_18], %21 {strides = array<i32>} : memref<16x32xf32, #tpu.memory_space<vmem>>, vector<16x32xf32>,
    } else {
    }
    %c0 = arith.constant 0 : index
    %c0_1 = arith.constant 0 : index
    %3 = vector.load %arg2[%c0, %c0_1] : memref<16x32xf32, #tpu.memory_space<vmem>>, vector<16x32xf32>
    %4 = arith.truncf %3 : vector<16x32xf32> to vector<16x32xbf16>
    %c0_2 = arith.constant 0 : index
    %c0_3 = arith.constant 0 : index
    %5 = vector.load %arg3[%c0_2, %c0_3] : memref<32x64xbf16, #tpu.memory_space<vmem>>, vector<32x64xbf16>
    %cst = arith.constant dense<0.000000e+00> : vector<16x64xf32>
    %6 = tpu.matmul %4, %5, %cst {dimension_numbers = #tpu.dot_dimension_numbers<[1], [0], [0], [1], [0, 0, 1, 1], [], []>} : vector<16x32xbf16>, vector<32x64xbf16>, vector<16x64xf32> -> vector<16x64xf32>
    %c0_4 = arith.constant 0 : index
    %c0_5 = arith.constant 0 : index
    %7 = vector.load %arg4[%c0_4, %c0_5] : memref<1x64xf32, #tpu.memory_space<vmem>>, vector<1x64xf32>
    %8 = vector.broadcast %7 : vector<1x64xf32> to vector<16x64xf32>
    %9 = arith.addf %6, %8 : vector<16x64xf32>
    %cst_6 = arith.constant 0.000000e+00 : f32
    %10 = vector.broadcast %cst_6 : f32 to vector<16x64xf32>
    %11 = arith.maximumf %9, %10 : vector<16x64xf32>
    %c0_7 = arith.constant 0 : index
    %c0_8 = arith.constant 0 : index
    %12 = vector.load %arg8[%c0_7, %c0_8] : memref<16x32xf32, #tpu.memory_space<vmem>>, vector<16x32xf32>
    %13 = arith.truncf %11 : vector<16x64xf32> to vector<16x64xbf16>
    %c0_9 = arith.constant 0 : index
    %c0_10 = arith.constant 0 : index
    %14 = vector.load %arg5[%c0_9, %c0_10] : memref<64x32xbf16, #tpu.memory_space<vmem>>, vector<64x32xbf16>
    %cst_11 = arith.constant dense<0.000000e+00> : vector<16x32xf32>
    %15 = tpu.matmul %13, %14, %cst_11 {dimension_numbers = #tpu.dot_dimension_numbers<[1], [0], [0], [1], [0, 0, 1, 1], [], []>} : vector<16x64xbf16>, vector<64x32xbf16>, vector<16x32xf32> -> vector<16x32xf32>
    %16 = arith.addf %12, %15 : vector<16x32xf32>
    %c0_12 = arith.constant 0 : index
    %c0_13 = arith.constant 0 : index
    %17 = vector.load %arg8[%c0_12, %c0_13] : memref<16x32xf32, #tpu.memory_space<vmem>>, vector<16x32xf32>
    tpu.vector_store %arg8[%c0_12, %c0_13], %16 {strides = array<i32>} : memref<16x32xf32, #tpu.memory_space<vmem>>, vector<16x32xf32>,
    %c0_i32_14 = arith.constant 0 : i32
    %18 = arith.cmpi eq, %arg1, %c0_i32_14 : i32
    %19 = arith.extui %18 : i1 to i32
    %c0_i32_15 = arith.constant 0 : i32
    %20 = arith.cmpi ne, %19, %c0_i32_15 : i32
    scf.if %20 {
      %c0_16 = arith.constant 0 : index
      %c0_17 = arith.constant 0 : index
      %21 = vector.load %arg8[%c0_16, %c0_17] : memref<16x32xf32, #tpu.memory_space<vmem>>, vector<16x32xf32>
      %c0_18 = arith.constant 0 : index
      %c0_19 = arith.constant 0 : index
      %22 = vector.load %arg6[%c0_18, %c0_19] : memref<1x32xf32, #tpu.memory_space<vmem>>, vector<1x32xf32>
      %23 = vector.broadcast %22 : vector<1x32xf32> to vector<16x32xf32>
      %24 = arith.addf %21, %23 : vector<16x32xf32>
      %c0_20 = arith.constant 0 : index
      %c0_21 = arith.constant 0 : index
      %25 = vector.load %arg7[%c0_20, %c0_21] : memref<16x32xf32, #tpu.memory_space<vmem>>, vector<16x32xf32>
      tpu.vector_store %arg7[%c0_20, %c0_21], %24 {strides = array<i32>} : memref<16x32xf32, #tpu.memory_space<vmem>>, vector<16x32xf32>,
    } else {
    }
    return
  }
  func.func @transform_0(%arg0: i32, %arg1: i32) -> (i32, i32) {
    %c0_i32 = arith.constant 0 : i32
    %c0_i32_0 = arith.constant 0 : i32
    return %arg0, %c0_i32 : i32, i32
  }
  func.func @transform_1(%arg0: i32, %arg1: i32) -> (i32, i32) {
    %c0_i32 = arith.constant 0 : i32
    %c0_i32_0 = arith.constant 0 : i32
    return %c0_i32, %arg1 : i32, i32
  }
  func.func @transform_2(%arg0: i32, %arg1: i32) -> (i32, i32) {
    %c0_i32 = arith.constant 0 : i32
    %c0_i32_0 = arith.constant 0 : i32
    return %c0_i32, %arg1 : i32, i32
  }
  func.func @transform_3(%arg0: i32, %arg1: i32) -> (i32, i32) {
    %c0_i32 = arith.constant 0 : i32
    %c0_i32_0 = arith.constant 0 : i32
    return %arg1, %c0_i32 : i32, i32
  }
  func.func @transform_4(%arg0: i32, %arg1: i32) -> (i32, i32) {
    %c0_i32 = arith.constant 0 : i32
    %c0_i32_0 = arith.constant 0 : i32
    %c0_i32_1 = arith.constant 0 : i32
    return %c0_i32, %c0_i32_0 : i32, i32
  }
  func.func @transform_5(%arg0: i32, %arg1: i32) -> (i32, i32) {
    %c0_i32 = arith.constant 0 : i32
    %c0_i32_0 = arith.constant 0 : i32
    return %arg0, %c0_i32 : i32, i32
  }
}

module attributes {stable_mosaic.version = 11 : i64} {
  func.func @_linear_kernel(%arg0: i32, %arg1: i32, %arg2: i32, %arg3: memref<16x32xf32, #tpu.memory_space<vmem>>, %arg4: memref<32x64xbf16, #tpu.memory_space<vmem>>, %arg5: memref<1x64xf32, #tpu.memory_space<vmem>>, %arg6: memref<16x64xf32, #tpu.memory_space<vmem>>, %arg7: memref<16x64xf32, #tpu.memory_space<vmem>>) attributes {dimension_semantics = [#tpu.dimension_semantics<parallel>, #tpu.dimension_semantics<parallel>, #tpu.dimension_semantics<arbitrary>], iteration_bounds = array<i64: 1, 1, 1>, scalar_prefetch = 0 : i64, scratch_operands = 1 : i64, tpu.core_type = #tpu.core_type<tc>, window_params = [{transform_indices = @transform_0, window_bounds = array<i64: 16, 32>}, {transform_indices = @transform_1, window_bounds = array<i64: 32, 64>}, {transform_indices = @transform_2, window_bounds = array<i64: 1, 64>}, {transform_indices = @transform_3, window_bounds = array<i64: 16, 64>}]} {
    %c0_i32 = arith.constant 0 : i32
    %0 = arith.cmpi eq, %arg2, %c0_i32 : i32
    %1 = arith.extui %0 : i1 to i32
    %c0_i32_0 = arith.constant 0 : i32
    %2 = arith.cmpi ne, %1, %c0_i32_0 : i32
    scf.if %2 {
      %cst_10 = arith.constant 0.000000e+00 : f32
      %13 = vector.broadcast %cst_10 : f32 to vector<16x64xf32>
      %c0_11 = arith.constant 0 : index
      %c0_12 = arith.constant 0 : index
      %14 = vector.load %arg7[%c0_11, %c0_12] : memref<16x64xf32, #tpu.memory_space<vmem>>, vector<16x64xf32>
      tpu.vector_store %arg7[%c0_11, %c0_12], %13 {strides = array<i32>} : memref<16x64xf32, #tpu.memory_space<vmem>>, vector<16x64xf32>,
    } else {
    }
    %c0 = arith.constant 0 : index
    %c0_1 = arith.constant 0 : index
    %3 = vector.load %arg7[%c0, %c0_1] : memref<16x64xf32, #tpu.memory_space<vmem>>, vector<16x64xf32>
    %c0_2 = arith.constant 0 : index
    %c0_3 = arith.constant 0 : index
    %4 = vector.load %arg3[%c0_2, %c0_3] : memref<16x32xf32, #tpu.memory_space<vmem>>, vector<16x32xf32>
    %5 = arith.truncf %4 : vector<16x32xf32> to vector<16x32xbf16>
    %c0_4 = arith.constant 0 : index
    %c0_5 = arith.constant 0 : index
    %6 = vector.load %arg4[%c0_4, %c0_5] : memref<32x64xbf16, #tpu.memory_space<vmem>>, vector<32x64xbf16>
    %cst = arith.constant dense<0.000000e+00> : vector<16x64xf32>
    %7 = tpu.matmul %5, %6, %cst {dimension_numbers = #tpu.dot_dimension_numbers<[1], [0], [0], [1], [0, 0, 1, 1], [], []>} : vector<16x32xbf16>, vector<32x64xbf16>, vector<16x64xf32> -> vector<16x64xf32>
    %8 = arith.addf %3, %7 : vector<16x64xf32>
    %c0_6 = arith.constant 0 : index
    %c0_7 = arith.constant 0 : index
    %9 = vector.load %arg7[%c0_6, %c0_7] : memref<16x64xf32, #tpu.memory_space<vmem>>, vector<16x64xf32>
    tpu.vector_store %arg7[%c0_6, %c0_7], %8 {strides = array<i32>} : memref<16x64xf32, #tpu.memory_space<vmem>>, vector<16x64xf32>,
    %c0_i32_8 = arith.constant 0 : i32
    %10 = arith.cmpi eq, %arg2, %c0_i32_8 : i32
    %11 = arith.extui %10 : i1 to i32
    %c0_i32_9 = arith.constant 0 : i32
    %12 = arith.cmpi ne, %11, %c0_i32_9 : i32
    scf.if %12 {
      %c0_10 = arith.constant 0 : index
      %c0_11 = arith.constant 0 : index
      %13 = vector.load %arg7[%c0_10, %c0_11] : memref<16x64xf32, #tpu.memory_space<vmem>>, vector<16x64xf32>
      %c0_12 = arith.constant 0 : index
      %c0_13 = arith.constant 0 : index
      %14 = vector.load %arg5[%c0_12, %c0_13] : memref<1x64xf32, #tpu.memory_space<vmem>>, vector<1x64xf32>
      %15 = vector.broadcast %14 : vector<1x64xf32> to vector<16x64xf32>
      %16 = arith.addf %13, %15 : vector<16x64xf32>
      %c0_14 = arith.constant 0 : index
      %c0_15 = arith.constant 0 : index
      %17 = vector.load %arg6[%c0_14, %c0_15] : memref<16x64xf32, #tpu.memory_space<vmem>>, vector<16x64xf32>
      tpu.vector_store %arg6[%c0_14, %c0_15], %16 {strides = array<i32>} : memref<16x64xf32, #tpu.memory_space<vmem>>, vector<16x64xf32>,
    } else {
    }
    return
  }
  func.func @transform_0(%arg0: i32, %arg1: i32, %arg2: i32) -> (i32, i32) {
    %c0_i32 = arith.constant 0 : i32
    return %arg0, %arg2 : i32, i32
  }
  func.func @transform_1(%arg0: i32, %arg1: i32, %arg2: i32) -> (i32, i32) {
    %c0_i32 = arith.constant 0 : i32
    return %arg2, %arg1 : i32, i32
  }
  func.func @transform_2(%arg0: i32, %arg1: i32, %arg2: i32) -> (i32, i32) {
    %c0_i32 = arith.constant 0 : i32
    %c0_i32_0 = arith.constant 0 : i32
    return %c0_i32, %arg1 : i32, i32
  }
  func.func @transform_3(%arg0: i32, %arg1: i32, %arg2: i32) -> (i32, i32) {
    %c0_i32 = arith.constant 0 : i32
    return %arg0, %arg1 : i32, i32
  }
}

module attributes {stable_mosaic.version = 11 : i64} {
  func.func @_linear_kernel(%arg0: i32, %arg1: i32, %arg2: i32, %arg3: memref<16x32xf32, #tpu.memory_space<vmem>>, %arg4: memref<32x32xbf16, #tpu.memory_space<vmem>>, %arg5: memref<1x32xf32, #tpu.memory_space<vmem>>, %arg6: memref<16x32xf32, #tpu.memory_space<vmem>>, %arg7: memref<16x32xf32, #tpu.memory_space<vmem>>) attributes {dimension_semantics = [#tpu.dimension_semantics<parallel>, #tpu.dimension_semantics<parallel>, #tpu.dimension_semantics<arbitrary>], iteration_bounds = array<i64: 1, 1, 1>, scalar_prefetch = 0 : i64, scratch_operands = 1 : i64, tpu.core_type = #tpu.core_type<tc>, window_params = [{transform_indices = @transform_0, window_bounds = array<i64: 16, 32>}, {transform_indices = @transform_1, window_bounds = array<i64: 32, 32>}, {transform_indices = @transform_2, window_bounds = array<i64: 1, 32>}, {transform_indices = @transform_3, window_bounds = array<i64: 16, 32>}]} {
    %c0_i32 = arith.constant 0 : i32
    %0 = arith.cmpi eq, %arg2, %c0_i32 : i32
    %1 = arith.extui %0 : i1 to i32
    %c0_i32_0 = arith.constant 0 : i32
    %2 = arith.cmpi ne, %1, %c0_i32_0 : i32
    scf.if %2 {
      %cst_10 = arith.constant 0.000000e+00 : f32
      %13 = vector.broadcast %cst_10 : f32 to vector<16x32xf32>
      %c0_11 = arith.constant 0 : index
      %c0_12 = arith.constant 0 : index
      %14 = vector.load %arg7[%c0_11, %c0_12] : memref<16x32xf32, #tpu.memory_space<vmem>>, vector<16x32xf32>
      tpu.vector_store %arg7[%c0_11, %c0_12], %13 {strides = array<i32>} : memref<16x32xf32, #tpu.memory_space<vmem>>, vector<16x32xf32>,
    } else {
    }
    %c0 = arith.constant 0 : index
    %c0_1 = arith.constant 0 : index
    %3 = vector.load %arg7[%c0, %c0_1] : memref<16x32xf32, #tpu.memory_space<vmem>>, vector<16x32xf32>
    %c0_2 = arith.constant 0 : index
    %c0_3 = arith.constant 0 : index
    %4 = vector.load %arg3[%c0_2, %c0_3] : memref<16x32xf32, #tpu.memory_space<vmem>>, vector<16x32xf32>
    %5 = arith.truncf %4 : vector<16x32xf32> to vector<16x32xbf16>
    %c0_4 = arith.constant 0 : index
    %c0_5 = arith.constant 0 : index
    %6 = vector.load %arg4[%c0_4, %c0_5] : memref<32x32xbf16, #tpu.memory_space<vmem>>, vector<32x32xbf16>
    %cst = arith.constant dense<0.000000e+00> : vector<16x32xf32>
    %7 = tpu.matmul %5, %6, %cst {dimension_numbers = #tpu.dot_dimension_numbers<[1], [0], [0], [1], [0, 0, 1, 1], [], []>} : vector<16x32xbf16>, vector<32x32xbf16>, vector<16x32xf32> -> vector<16x32xf32>
    %8 = arith.addf %3, %7 : vector<16x32xf32>
    %c0_6 = arith.constant 0 : index
    %c0_7 = arith.constant 0 : index
    %9 = vector.load %arg7[%c0_6, %c0_7] : memref<16x32xf32, #tpu.memory_space<vmem>>, vector<16x32xf32>
    tpu.vector_store %arg7[%c0_6, %c0_7], %8 {strides = array<i32>} : memref<16x32xf32, #tpu.memory_space<vmem>>, vector<16x32xf32>,
    %c0_i32_8 = arith.constant 0 : i32
    %10 = arith.cmpi eq, %arg2, %c0_i32_8 : i32
    %11 = arith.extui %10 : i1 to i32
    %c0_i32_9 = arith.constant 0 : i32
    %12 = arith.cmpi ne, %11, %c0_i32_9 : i32
    scf.if %12 {
      %c0_10 = arith.constant 0 : index
      %c0_11 = arith.constant 0 : index
      %13 = vector.load %arg7[%c0_10, %c0_11] : memref<16x32xf32, #tpu.memory_space<vmem>>, vector<16x32xf32>
      %c0_12 = arith.constant 0 : index
      %c0_13 = arith.constant 0 : index
      %14 = vector.load %arg5[%c0_12, %c0_13] : memref<1x32xf32, #tpu.memory_space<vmem>>, vector<1x32xf32>
      %15 = vector.broadcast %14 : vector<1x32xf32> to vector<16x32xf32>
      %16 = arith.addf %13, %15 : vector<16x32xf32>
      %c0_14 = arith.constant 0 : index
      %c0_15 = arith.constant 0 : index
      %17 = vector.load %arg6[%c0_14, %c0_15] : memref<16x32xf32, #tpu.memory_space<vmem>>, vector<16x32xf32>
      tpu.vector_store %arg6[%c0_14, %c0_15], %16 {strides = array<i32>} : memref<16x32xf32, #tpu.memory_space<vmem>>, vector<16x32xf32>,
    } else {
    }
    return
  }
  func.func @transform_0(%arg0: i32, %arg1: i32, %arg2: i32) -> (i32, i32) {
    %c0_i32 = arith.constant 0 : i32
    return %arg0, %arg2 : i32, i32
  }
  func.func @transform_1(%arg0: i32, %arg1: i32, %arg2: i32) -> (i32, i32) {
    %c0_i32 = arith.constant 0 : i32
    return %arg2, %arg1 : i32, i32
  }
  func.func @transform_2(%arg0: i32, %arg1: i32, %arg2: i32) -> (i32, i32) {
    %c0_i32 = arith.constant 0 : i32
    %c0_i32_0 = arith.constant 0 : i32
    return %c0_i32, %arg1 : i32, i32
  }
  func.func @transform_3(%arg0: i32, %arg1: i32, %arg2: i32) -> (i32, i32) {
    %c0_i32 = arith.constant 0 : i32
    return %arg0, %arg1 : i32, i32
  }
}

</mosaic_0001>

<bundles_post_ra>
// kernel: transformer_forward.50
= control target key start
LH: loop header
LB: loop body
LE: loop exit
PB: predicated region body
PF: predicated region fallthrough
CT: control target
= control target key end

     0   :  { %vm23_vm0 = vcmask 261120   ;;  %s136_s0 = inlined_call_operand.vmem [shape: f32[16,32], index: 0, kind: input, shape index: {}]   ;;  %s137_s1 = inlined_call_operand.vmem [shape: f32[16,32], index: 1, kind: input, shape index: {}]   ;;  %s138_s2 = inlined_call_operand.vmem [shape: f32[1,32], index: 2, kind: input, shape index: {}]   ;;  %s139_s3 = inlined_call_operand.vmem [shape: f32[1,32], index: 3, kind: input, shape index: {}]   ;;  %s140_s4 = inlined_call_operand.vmem [shape: f32[16,32], index: 4, kind: output, shape index: {}]  }
   0x1   :  { %v17_v0 = vld [vmem:[%s136_s0] sm:$0xff]  ;;  %v18_v2 = vld [vmem:[%s136_s0 + $0x8] sm:$0xff] }
   0x2   :  { %v19_v1 = vld [vmem:[%s137_s1] sm:$0xff]  ;;  %v20_v4 = vld [vmem:[%s137_s1 + $0x8] sm:$0xff] }
   0x3   :  { %v21_v3 = vadd.f32 %v19_v1, %v17_v0  ;;  %v22_v5 = vadd.f32 %v20_v4, %v18_v2  ;;  %v75_v25 = vld [vmem:[%s138_s2] ss:$0 sm:$0xff] }
   0x4   :  { %v76_v27 = vld [vmem:[%s139_s3] ss:$0 sm:$0xff] }
   0x5   :  { %v24_v6 = vsel %vm23_vm0, %v21_v3, 0.0  ;;  %v27_v7 = vsel %vm23_vm0, %v22_v5, 0.0 }
   0x6   :  { %25 = vadd.xlane.f32.xlu0 %v24_v6 }
   0xa   :  { %28 = vadd.xlane.f32.xlu0 %v27_v7 }
  0x8f   :  { %v26_v8 = vpop.xlane.xlu0 %25 }
  0x90   :  { %v31_v9 = vmul.f32 0.03125, %v26_v8 }
  0x92   :  { %v33_v10 = vsub.f32 %v21_v3, %v31_v9 }
  0x93   :  { %v29_v11 = vpop.xlane.xlu0 %28 }
  0x94   :  { %v32_v12 = vmul.f32 0.03125, %v29_v11  ;;  %v35_v13 = vmul.f32 %v33_v10, %v33_v10 }
  0x96   :  { %v34_v14 = vsub.f32 %v22_v5, %v32_v12  ;;  %v37_v15 = vsel %vm23_vm0, %v35_v13, 0.0 }
  0x97   :  { %38 = vadd.xlane.f32.xlu1 %v37_v15 }
  0x98   :  { %v36_v16 = vmul.f32 %v34_v14, %v34_v14 }
  0x9a   :  { %v40_v17 = vsel %vm23_vm0, %v36_v16, 0.0 }
  0x9b   :  { %41 = vadd.xlane.f32.xlu1 %v40_v17 }
 0x120   :  { %v39_v18 = vpop.xlane.xlu1 %38 }
 0x121   :  { %v43_v19 = vmul.f32 0.03125, %v39_v18 }
 0x123   :  { %v45_v20 = vadd.f32 1e-05, %v43_v19 }
 0x124   :  { %v42_v21 = vpop.xlane.xlu1 %41 }
 0x125   :  { %77 = vrsqrt.f32 %v45_v20  ;;  %v44_v22 = vmul.f32 0.03125, %v42_v21 }
 0x127   :  { %v46_v23 = vadd.f32 1e-05, %v44_v22 }
 0x129   :  { %79 = vrsqrt.f32 %v46_v23 }
 0x132   :  { %v78_v24 = vpop.eup %77 }
 0x133   :  { %v49_v26 = vmul.f32 %v78_v24, %v33_v10 }
 0x135   :  { %v58_v28 = vmul.f32 %v75_v25, %v49_v26 }
 0x136   :  { %v80_v29 = vpop.eup %79 }
 0x137   :  { %v67_v30 = vadd.f32 %v76_v27, %v58_v28  ;;  %v50_v31 = vmul.f32 %v80_v29, %v34_v14 }
 0x139   :  { %69 = vst.msk [vmem:[%s140_s4] sm:$0xff] %vm23_vm0, %v67_v30  ;;  %v59_v32 = vmul.f32 %v75_v25, %v50_v31 }
 0x13b   :  { %v68_v33 = vadd.f32 %v76_v27, %v59_v32 }
 0x13d   :  { %70 = vst.msk [vmem:[%s140_s4 + $0x8] sm:$0xff] %vm23_vm0, %v68_v33 }

// kernel: transformer_forward.47
= control target key start
LH: loop header
LB: loop body
LE: loop exit
PB: predicated region body
PF: predicated region fallthrough
CT: control target
= control target key end

     0   :  { %vm19_vm0 = vcmask 785408   ;;  %v132_v0 = vmov 0.0   ;;  %vm133_vm1 = vmmov 0   ;;  %vm43_vm2 = vcmask 261120   ;;  %s181_s1 = inlined_call_operand.vmem [shape: bf16[32,96], index: 1, kind: input, shape index: {}]   ;;  %s182_s0 = inlined_call_operand.vmem [shape: f32[16,32], index: 0, kind: input, shape index: {}]   ;;  %s183_s2 = inlined_call_operand.vmem [shape: f32[1,96], index: 2, kind: input, shape index: {}]   ;;  %s184_s3 = inlined_call_operand.vmem [shape: f32[16,96], index: 3, kind: output, shape index: {}]  }
   0x1   :  { %120 = vmatprep.subr.bf16.mxu0 %v132_v0  ;;  %v130_v1 = vld [vmem:[%s181_s1 + $0x8] sm:$0xff]   ;;  %124 = vmatprep.mubr.msk.bf16.mxu0 %vm133_vm1, %v132_v0  ;;  %20 = vst.msk [vmem:[#allocation2] sm:$0xff] %vm19_vm0, %v132_v0  ;;  %21 = vst.msk [vmem:[#allocation2 + $0x8] sm:$0xff] %vm19_vm0, %v132_v0  ;;  %v131_v2 = vld [vmem:[%s181_s1] sm:$0xff]  }
   0x2   :  { %121 = vmatpush3.bf16.msra.mxu0 %v130_v1  ;;  %v24_v3 = vld [vmem:[%s182_s0] sm:$0xff]  ;;  %v25_v4 = vld [vmem:[%s182_s0 + $0x8] sm:$0xff] }
   0x3   :  { %122 = vmatprep.subr.bf16.mxu0 %v132_v0  ;;  %v26_v5 = vpack.c.bf16 %v25_v4, %v24_v3  ;;  %v116_v14 = vld [vmem:[%s183_s2] ss:$0 sm:$0xff] }
   0x6   :  { %123 = vmatpush3.bf16.msra.mxu0 %v131_v2 }
   0x8   :  { %v22_v6 = vld [vmem:[#allocation2] sm:$0xff]  ;;  %v23_v10 = vld [vmem:[#allocation2 + $0x8] sm:$0xff] }
   0x9   :  { %125 = vmatmul.mubr.msk.bf16.vlgmr.msra.gmra.mxu0 %vm43_vm2, %v26_v5 }
  0xc9   :  { %v81_v7 = vpop.f32.mrf.mxu0 }
  0xca   :  { %v88_v8 = vadd.f32 %v81_v7, %v22_v6 }
  0xcb   :  { %v126_v9 = vpop.f32.mrf.mxu0 }
  0xcc   :  { %91 = vst.msk [vmem:[#allocation2] sm:$0xff] %vm19_vm0, %v88_v8 }
  0xcd   :  { %v84_v11 = vpop.f32.mrf.mxu0 }
  0xce   :  { %v89_v12 = vadd.f32 %v84_v11, %v23_v10 }
  0xcf   :  { %v127_v13 = vpop.f32.mrf.mxu0 }
  0xd0   :  { %92 = vst.msk [vmem:[#allocation2 + $0x8] sm:$0xff] %vm19_vm0, %v89_v12 }
  0xd3   :  { %v96_v15 = vld [vmem:[#allocation2] sm:$0xff] }
  0xd4   :  { %v105_v16 = vadd.f32 %v116_v14, %v96_v15 }
  0xd6   :  { %107 = vst.msk [vmem:[%s184_s3] sm:$0xff] %vm19_vm0, %v105_v16 }
  0xd7   :  { %v97_v17 = vld [vmem:[#allocation2 + $0x8] sm:$0xff] }
  0xd8   :  { %v106_v18 = vadd.f32 %v116_v14, %v97_v17 }
  0xda   :  { %108 = vst.msk [vmem:[%s184_s3 + $0x8] sm:$0xff] %vm19_vm0, %v106_v18 }

// kernel: transformer_forward.49
= control target key start
LH: loop header
LB: loop body
LE: loop exit
PB: predicated region body
PF: predicated region fallthrough
CT: control target
= control target key end

     0   :  { %vm19_vm0 = vcmask 261120   ;;  %v137_v0 = vmov 0.0   ;;  %vm138_vm1 = vmmov 0   ;;  %s184_s1 = inlined_call_operand.vmem [shape: bf16[32,32], index: 1, kind: input, shape index: {}]   ;;  %s185_s0 = inlined_call_operand.vmem [shape: bf16[16,32], index: 0, kind: input, shape index: {}]   ;;  %s186_s2 = inlined_call_operand.vmem [shape: f32[1,32], index: 2, kind: input, shape index: {}]   ;;  %s187_s3 = inlined_call_operand.vmem [shape: f32[16,32], index: 3, kind: output, shape index: {}]  }
   0x1   :  { %124 = vmatprep.subr.bf16.mxu0 %v137_v0  ;;  %v134_v1 = vld [vmem:[%s184_s1 + $0x8] sm:$0xff]   ;;  %128 = vmatprep.mubr.msk.bf16.mxu0 %vm138_vm1, %v137_v0  ;;  %20 = vst.msk [vmem:[#allocation2] sm:$0xff] %vm19_vm0, %v137_v0  ;;  %21 = vst.msk [vmem:[#allocation2 + $0x8] sm:$0xff] %vm19_vm0, %v137_v0  ;;  %v135_v2 = vld [vmem:[%s184_s1] sm:$0xff]  }
   0x2   :  { %125 = vmatpush3.bf16.msra.mxu0 %v134_v1  ;;  %v136_v3 = vld [vmem:[%s185_s0] sm:$0xff]  }
   0x3   :  { %126 = vmatprep.subr.bf16.mxu0 %v137_v0  ;;  %v120_v12 = vld [vmem:[%s186_s2] ss:$0 sm:$0xff] }
   0x6   :  { %127 = vmatpush3.bf16.msra.mxu0 %v135_v2 }
   0x8   :  { %v22_v4 = vld [vmem:[#allocation2] sm:$0xff]  ;;  %v23_v8 = vld [vmem:[#allocation2 + $0x8] sm:$0xff] }
   0x9   :  { %129 = vmatmul.mubr.msk.bf16.vlgmr.msra.gmra.mxu0 %vm19_vm0, %v136_v3 }
  0xc9   :  { %v85_v5 = vpop.f32.mrf.mxu0 }
  0xca   :  { %v92_v6 = vadd.f32 %v85_v5, %v22_v4 }
  0xcb   :  { %v130_v7 = vpop.f32.mrf.mxu0 }
  0xcc   :  { %94 = vst.msk [vmem:[#allocation2] sm:$0xff] %vm19_vm0, %v92_v6 }
  0xcd   :  { %v88_v9 = vpop.f32.mrf.mxu0 }
  0xce   :  { %v93_v10 = vadd.f32 %v88_v9, %v23_v8 }
  0xcf   :  { %v131_v11 = vpop.f32.mrf.mxu0 }
  0xd0   :  { %95 = vst.msk [vmem:[#allocation2 + $0x8] sm:$0xff] %vm19_vm0, %v93_v10 }
  0xd3   :  { %v99_v13 = vld [vmem:[#allocation2] sm:$0xff] }
  0xd4   :  { %v108_v14 = vadd.f32 %v120_v12, %v99_v13 }
  0xd6   :  { %110 = vst.msk [vmem:[%s187_s3] sm:$0xff] %vm19_vm0, %v108_v14 }
  0xd7   :  { %v100_v15 = vld [vmem:[#allocation2 + $0x8] sm:$0xff] }
  0xd8   :  { %v109_v16 = vadd.f32 %v120_v12, %v100_v15 }
  0xda   :  { %111 = vst.msk [vmem:[%s187_s3 + $0x8] sm:$0xff] %vm19_vm0, %v109_v16 }

// kernel: transformer_forward.48
= control target key start
LH: loop header
LB: loop body
LE: loop exit
PB: predicated region body
PF: predicated region fallthrough
CT: control target
= control target key end

     0   :  { %s644_s12 = smov 0   ;;  %s646_s13 = smov 0   ;;  %s710_s0 = inlined_call_operand.vmem [shape: f32[2,4,8,8], index: 0, kind: input, shape index: {}]   ;;  %s711_s1 = inlined_call_operand.vmem [shape: f32[2,4,8,8], index: 1, kind: input, shape index: {}]   ;;  %s712_s2 = inlined_call_operand.vmem [shape: f32[2,4,8,8], index: 2, kind: input, shape index: {}]   ;;  %s713_s3 = inlined_call_operand.vmem [shape: bf16[2,4,8,8], index: 3, kind: output, shape index: {}]  }
   0x1   :  { %s648_s14 = smov 0   ;;  %s650_s15 = smov 0  }
   0x2   :  { %s652_s16 = smov 0  }
   0x3 LB: > { %s22_s17 = sadd.s32 1, %s612_s14  ;;  %s25_s18 = sadd.s32 1, %s616_s15  ;;  %s620_s16 = sphi %s652_s16, %s13_s16   ;;  %s616_s15 = sphi %s650_s15, %s717_s15   ;;  %s612_s14 = sphi %s648_s14, %s716_s14   ;;  %s608_s13 = sphi %s646_s13, %s715_s13   ;;  %s604_s12 = sphi %s644_s12, %s714_s12  }
   0x4   : > { %p23_p0 = scmp.ge.s32.totalorder %s22_s17, 4  ;;  %p507_p1 = scmp.ge.s32.totalorder %s620_s16, 1 }
   0x5   : > { %p186_p2 = scmp.lt.s32.totalorder %s620_s16, 9 }
   0x6   : > { %s719_s17 = smov (%p23_p0, %s22_s17), 0  ;;  %s721_s18 = smov (!%p23_p0, %s25_s18), %s616_s15 }
   0x7   : > { %p187_p3 = pnand %p507_p1, %p186_p2  ;;  %p27_p4 = scmp.ge.s32.totalorder %s721_s18, 2 }
   0x8   : > { %p232_p5 = scmp.lt.s32.totalorder (!%p187_p3), %s608_s13, 1  ;;  %p234_p6 = scmp.lt.s32.totalorder (!%p187_p3), %s604_s12, 3 }
   0x9   : > { %s723_s18 = smov (%p27_p4, %s721_s18), 0  ;;  %190 = sbr.rel (%p187_p3) target bundleno = 738 (0x2e2), region = 32 }
   0xe   : > { %v622_v0 = vmov 0.0   ;;  %vm623_vm0 = vmmov 0   ;;  %s725_s13 = smov (!%p232_p5, %s608_s13), 1  ;;  %s727_s12 = smov (!%p234_p6, %s604_s12), 3  ;;  %vm271_vm1 = vcmask 64512   ;;  %vm334_vm2 = vcmask 1043456  }
   0xf   : > { %524 = vmatprep.subr.bf16.mxu0 %v622_v0  ;;  %526 = vmatprep.mubr.msk.bf16.mxu0 %vm623_vm0, %v622_v0  ;;  %s508_s19 = sshll.u32 %s725_s13, 2  ;;  %vm379_vm3 = vcmask 60416  }
  0x10   : > { %530 = vmatprep.subr.bf16.mxu1 %v622_v0  ;;  %532 = vmatprep.mubr.msk.bf16.mxu1 %vm623_vm0, %v622_v0  ;;  %s674_s20 = sadd.s32 %s508_s19, %s727_s12 }
  0x11   : > { %s509_s21 = sshll.u32 %s674_s20, 3  ;;  %s515_s4 = sshll.u32 %s674_s20, 2 }
  0x12   : > { %s247_s24 = scalar_lea.vmem %s711_s1, %s509_s21  ;;  %s239_s27 = scalar_lea.vmem %s710_s0, %s509_s21 }
  0x13   : > { %v267_v1 = vld [vmem:[%s247_s24] sm:$0xff]  ;;  %s255_s30 = scalar_lea.vmem %s712_s2, %s509_s21  ;;  %s263_s7 = scalar_lea.vmem %s713_s3, %s515_s4 }
  0x14   : > { %v268_v2 = vpack.c.bf16 %v267_v1, %v267_v1  ;;  %v265_v4 = vld [vmem:[%s239_s27] sm:$0xff] }
  0x15   : > { %v266_v5 = vpack.c.bf16 %v265_v4, %v265_v4  ;;  %v269_v17 = vld [vmem:[%s255_s30] sm:$0xff] }
  0x16   : > { %v276_v3 = vsel %vm271_vm1, %v268_v2, 0  ;;  %v270_v18 = vpack.c.bf16 %v269_v17, %v269_v17 }
  0x17   : > { %525 = vmatpush3.bf16.xpose.msra.mxu0 %v276_v3 }
  0x18   : > { %v336_v19 = vsel %vm334_vm2, %v270_v18, 0 }
  0x19   : > { %531 = vmatpush3.bf16.msra.mxu1 %v336_v19 }
  0x1e   : > { %527 = vmatmul.mubr.msk.bf16.vlgmr.msra.gmra.mxu0 %vm271_vm1, %v266_v5 }
  0xde   : > { %v312_v6 = vpop.f32.mrf.mxu0 }
  0xdf   : > { %v318_v7 = vmul.f32 0.35355338, %v312_v6 }
  0xe0   : > { %v528_v8 = vpop.f32.mrf.mxu0 }
  0xe1   : > { %v319_v9 = vsel %vm271_vm1, %v318_v7, -inf }
  0xe2   : > { %320 = vmax.xlane.f32.xlu0 %v319_v9  ;;  %v315_v10 = vpop.f32.mrf.mxu0 }
  0xe4   : > { %v529_v11 = vpop.f32.mrf.mxu0 }
 0x16b   : > { %v321_v12 = vpop.xlane.xlu0 %320 }
 0x16c   : > { %v322_v13 = vsub.f32 %v318_v7, %v321_v12 }
 0x16e   : > { %v323_v14 = vmul.f32 1.442695, %v322_v13 }
 0x170   : > { %578 = vpow2.f32 %v323_v14 }
 0x17d   : > { %v579_v15 = vpop.eup %578 }
 0x17e   : > { %v325_v16 = vsel %vm271_vm1, %v579_v15, 0.0 }
 0x17f   : > { %326 = vadd.xlane.f32.xlu0 %v325_v16 }
 0x208   : > { %v327_v20 = vpop.xlane.xlu0 %326 }
 0x209   : > { %580 = vrcp.f32 %v327_v20 }
 0x216   : > { %v581_v21 = vpop.eup %580 }
 0x217   : > { %v329_v22 = vmul.f32 %v581_v21, %v579_v15 }
 0x219   : > { %v330_v23 = vpack.c.bf16 %v329_v22, %v329_v22 }
 0x21b   : > { %533 = vmatmul.mubr.msk.bf16.vlgmr.msra.gmra.mxu1 %vm271_vm1, %v330_v23 }
 0x2db   : > { %v372_v24 = vpop.f32.mrf.mxu1 }
 0x2dc   : > { %v378_v25 = vpack.c.bf16 %v372_v24, %v372_v24 }
 0x2dd   : > { %v534_v26 = vpop.f32.mrf.mxu1 }
 0x2de   : > { %380 = vst.msk [vmem:[%s263_s7] sm:$0xf] %vm379_vm3, %v378_v25 }
 0x2df   : > { %v375_v27 = vpop.f32.mrf.mxu1 }
 0x2e1   : > { %v535_v28 = vpop.f32.mrf.mxu1 }
 0x2e2 PF: > { %s13_s16 = sadd.s32 1, %s620_s16   ;;  %s714_s12 = smov %s612_s14 }
 0x2e3   : > { %p10_p7 = scmp.ge.s32.totalorder %s13_s16, 10   ;;  %s715_s13 = smov %s616_s15 }
 0x2e4   : > { %s716_s14 = smov %s719_s17  ;;  %s717_s15 = smov %s723_s18 }
 0x2e5   :  { %12 = sbr.rel (!%p10_p7) target bundleno = 3 (0x3), region = 68 }

// kernel: transformer_forward.51
= control target key start
LH: loop header
LB: loop body
LE: loop exit
PB: predicated region body
PF: predicated region fallthrough
CT: control target
= control target key end

     0   :  { %vm19_vm0 = vcmask 261120   ;;  %v131_v0 = vmov 0.0   ;;  %vm132_vm1 = vmmov 0   ;;  %s181_s1 = inlined_call_operand.vmem [shape: bf16[32,32], index: 1, kind: input, shape index: {}]   ;;  %s182_s0 = inlined_call_operand.vmem [shape: f32[16,32], index: 0, kind: input, shape index: {}]   ;;  %s183_s2 = inlined_call_operand.vmem [shape: f32[1,32], index: 2, kind: input, shape index: {}]   ;;  %s184_s3 = inlined_call_operand.vmem [shape: f32[16,32], index: 3, kind: output, shape index: {}]  }
   0x1   :  { %119 = vmatprep.subr.bf16.mxu0 %v131_v0  ;;  %v129_v1 = vld [vmem:[%s181_s1 + $0x8] sm:$0xff]   ;;  %123 = vmatprep.mubr.msk.bf16.mxu0 %vm132_vm1, %v131_v0  ;;  %20 = vst.msk [vmem:[#allocation2] sm:$0xff] %vm19_vm0, %v131_v0  ;;  %21 = vst.msk [vmem:[#allocation2 + $0x8] sm:$0xff] %vm19_vm0, %v131_v0  ;;  %v130_v2 = vld [vmem:[%s181_s1] sm:$0xff]  }
   0x2   :  { %120 = vmatpush3.bf16.msra.mxu0 %v129_v1  ;;  %v24_v3 = vld [vmem:[%s182_s0] sm:$0xff]  ;;  %v25_v4 = vld [vmem:[%s182_s0 + $0x8] sm:$0xff] }
   0x3   :  { %121 = vmatprep.subr.bf16.mxu0 %v131_v0  ;;  %v26_v5 = vpack.c.bf16 %v25_v4, %v24_v3  ;;  %v115_v14 = vld [vmem:[%s183_s2] ss:$0 sm:$0xff] }
   0x6   :  { %122 = vmatpush3.bf16.msra.mxu0 %v130_v2 }
   0x8   :  { %v22_v6 = vld [vmem:[#allocation2] sm:$0xff]  ;;  %v23_v10 = vld [vmem:[#allocation2 + $0x8] sm:$0xff] }
   0x9   :  { %124 = vmatmul.mubr.msk.bf16.vlgmr.msra.gmra.mxu0 %vm19_vm0, %v26_v5 }
  0xc9   :  { %v81_v7 = vpop.f32.mrf.mxu0 }
  0xca   :  { %v88_v8 = vadd.f32 %v81_v7, %v22_v6 }
  0xcb   :  { %v125_v9 = vpop.f32.mrf.mxu0 }
  0xcc   :  { %90 = vst.msk [vmem:[#allocation2] sm:$0xff] %vm19_vm0, %v88_v8 }
  0xcd   :  { %v84_v11 = vpop.f32.mrf.mxu0 }
  0xce   :  { %v89_v12 = vadd.f32 %v84_v11, %v23_v10 }
  0xcf   :  { %v126_v13 = vpop.f32.mrf.mxu0 }
  0xd0   :  { %91 = vst.msk [vmem:[#allocation2 + $0x8] sm:$0xff] %vm19_vm0, %v89_v12 }
  0xd3   :  { %v95_v15 = vld [vmem:[#allocation2] sm:$0xff] }
  0xd4   :  { %v104_v16 = vadd.f32 %v115_v14, %v95_v15 }
  0xd6   :  { %106 = vst.msk [vmem:[%s184_s3] sm:$0xff] %vm19_vm0, %v104_v16 }
  0xd7   :  { %v96_v17 = vld [vmem:[#allocation2 + $0x8] sm:$0xff] }
  0xd8   :  { %v105_v18 = vadd.f32 %v115_v14, %v96_v17 }
  0xda   :  { %107 = vst.msk [vmem:[%s184_s3 + $0x8] sm:$0xff] %vm19_vm0, %v105_v18 }

// kernel: transformer_forward.52
= control target key start
LH: loop header
LB: loop body
LE: loop exit
PB: predicated region body
PF: predicated region fallthrough
CT: control target
= control target key end

     0   :  { %vm19_vm0 = vcmask 523264   ;;  %v132_v0 = vmov 0.0   ;;  %vm133_vm1 = vmmov 0   ;;  %vm43_vm2 = vcmask 261120   ;;  %s181_s1 = inlined_call_operand.vmem [shape: bf16[32,64], index: 1, kind: input, shape index: {}]   ;;  %s182_s0 = inlined_call_operand.vmem [shape: f32[16,32], index: 0, kind: input, shape index: {}]   ;;  %s183_s2 = inlined_call_operand.vmem [shape: f32[1,64], index: 2, kind: input, shape index: {}]   ;;  %s184_s3 = inlined_call_operand.vmem [shape: f32[16,64], index: 3, kind: output, shape index: {}]  }
   0x1   :  { %120 = vmatprep.subr.bf16.mxu0 %v132_v0  ;;  %v130_v1 = vld [vmem:[%s181_s1 + $0x8] sm:$0xff]   ;;  %124 = vmatprep.mubr.msk.bf16.mxu0 %vm133_vm1, %v132_v0  ;;  %20 = vst.msk [vmem:[#allocation2] sm:$0xff] %vm19_vm0, %v132_v0  ;;  %21 = vst.msk [vmem:[#allocation2 + $0x8] sm:$0xff] %vm19_vm0, %v132_v0  ;;  %v131_v2 = vld [vmem:[%s181_s1] sm:$0xff]  }
   0x2   :  { %121 = vmatpush3.bf16.msra.mxu0 %v130_v1  ;;  %v24_v3 = vld [vmem:[%s182_s0] sm:$0xff]  ;;  %v25_v4 = vld [vmem:[%s182_s0 + $0x8] sm:$0xff] }
   0x3   :  { %122 = vmatprep.subr.bf16.mxu0 %v132_v0  ;;  %v26_v5 = vpack.c.bf16 %v25_v4, %v24_v3  ;;  %v116_v14 = vld [vmem:[%s183_s2] ss:$0 sm:$0xff] }
   0x6   :  { %123 = vmatpush3.bf16.msra.mxu0 %v131_v2 }
   0x8   :  { %v22_v6 = vld [vmem:[#allocation2] sm:$0xff]  ;;  %v23_v10 = vld [vmem:[#allocation2 + $0x8] sm:$0xff] }
   0x9   :  { %125 = vmatmul.mubr.msk.bf16.vlgmr.msra.gmra.mxu0 %vm43_vm2, %v26_v5 }
  0xc9   :  { %v81_v7 = vpop.f32.mrf.mxu0 }
  0xca   :  { %v88_v8 = vadd.f32 %v81_v7, %v22_v6 }
  0xcb   :  { %v126_v9 = vpop.f32.mrf.mxu0 }
  0xcc   :  { %91 = vst.msk [vmem:[#allocation2] sm:$0xff] %vm19_vm0, %v88_v8 }
  0xcd   :  { %v84_v11 = vpop.f32.mrf.mxu0 }
  0xce   :  { %v89_v12 = vadd.f32 %v84_v11, %v23_v10 }
  0xcf   :  { %v127_v13 = vpop.f32.mrf.mxu0 }
  0xd0   :  { %92 = vst.msk [vmem:[#allocation2 + $0x8] sm:$0xff] %vm19_vm0, %v89_v12 }
  0xd3   :  { %v96_v15 = vld [vmem:[#allocation2] sm:$0xff] }
  0xd4   :  { %v105_v16 = vadd.f32 %v116_v14, %v96_v15 }
  0xd6   :  { %107 = vst.msk [vmem:[%s184_s3] sm:$0xff] %vm19_vm0, %v105_v16 }
  0xd7   :  { %v97_v17 = vld [vmem:[#allocation2 + $0x8] sm:$0xff] }
  0xd8   :  { %v106_v18 = vadd.f32 %v116_v14, %v97_v17 }
  0xda   :  { %108 = vst.msk [vmem:[%s184_s3 + $0x8] sm:$0xff] %vm19_vm0, %v106_v18 }

// kernel: transformer_forward.39
= control target key start
LH: loop header
LB: loop body
LE: loop exit
PB: predicated region body
PF: predicated region fallthrough
CT: control target
= control target key end

     0   :  { %vm25_vm0 = vcmask 261120   ;;  %v251_v0 = vmov 0.0   ;;  %vm252_vm1 = vmmov 0   ;;  %vm136_vm2 = vcmask 523264   ;;  %s326_s1 = inlined_call_operand.vmem [shape: bf16[32,64], index: 1, kind: input, shape index: {}]   ;;  %s327_s0 = inlined_call_operand.vmem [shape: f32[16,32], index: 0, kind: input, shape index: {}]   ;;  %s328_s3 = inlined_call_operand.vmem [shape: bf16[64,32], index: 3, kind: input, shape index: {}]   ;;  %s329_s2 = inlined_call_operand.vmem [shape: f32[1,64], index: 2, kind: input, shape index: {}]   ;;  %s330_s4 = inlined_call_operand.vmem [shape: f32[1,32], index: 4, kind: input, shape index: {}]   ;;  %s331_s5 = inlined_call_operand.vmem [shape: f32[16,32], index: 5, kind: output, shape index: {}]  }
   0x1   :  { %223 = vmatprep.subr.bf16.mxu0 %v251_v0  ;;  %v245_v1 = vld [vmem:[%s326_s1 + $0x8] sm:$0xff]   ;;  %227 = vmatprep.mubr.msk.bf16.mxu0 %vm252_vm1, %v251_v0  ;;  %26 = vst.msk [vmem:[#allocation2] sm:$0xff] %vm25_vm0, %v251_v0  ;;  %27 = vst.msk [vmem:[#allocation2 + $0x8] sm:$0xff] %vm25_vm0, %v251_v0  ;;  %v246_v2 = vld [vmem:[%s326_s1] sm:$0xff]  }
   0x2   :  { %231 = vmatprep.subr.bf16.mxu1 %v251_v0  ;;  %239 = vmatprep.mubr.msk.bf16.mxu1 %vm252_vm1, %v251_v0  ;;  %v28_v3 = vld [vmem:[%s327_s0] sm:$0xff]  ;;  %v29_v4 = vld [vmem:[%s327_s0 + $0x8] sm:$0xff]  ;;  %v247_v5 = vld [vmem:[%s328_s3 + $0x18] sm:$0xff]  }
   0x3   :  { %224 = vmatpush3.bf16.msra.mxu0 %v245_v1  ;;  %v30_v6 = vpack.c.bf16 %v29_v4, %v28_v3  ;;  %232 = vmatpush3.bf16.msra.mxu1 %v247_v5  ;;  %v248_v7 = vld [vmem:[%s328_s3 + $0x10] sm:$0xff]   ;;  %v249_v8 = vld [vmem:[%s328_s3 + $0x8] sm:$0xff]   ;;  %v250_v9 = vld [vmem:[%s328_s3] sm:$0xff]  }
   0x4   :  { %225 = vmatprep.subr.bf16.mxu0 %v251_v0  ;;  %233 = vmatprep.subr.bf16.mxu1 %v251_v0  ;;  %v205_v10 = vld [vmem:[%s329_s2] ss:$0 sm:$0xff] }
   0x5   :  { %v214_v28 = vld [vmem:[%s330_s4] ss:$0 sm:$0xff] }
   0x7   :  { %226 = vmatpush3.bf16.msra.mxu0 %v246_v2  ;;  %234 = vmatpush3.bf16.msra.mxu1 %v248_v7 }
   0x8   :  { %235 = vmatprep.subr.bf16.mxu1 %v251_v0  ;;  %v101_v20 = vld [vmem:[#allocation2] sm:$0xff]  ;;  %v102_v24 = vld [vmem:[#allocation2 + $0x8] sm:$0xff] }
   0xa   :  { %228 = vmatmul.mubr.msk.bf16.vlgmr.msra.gmra.mxu0 %vm25_vm0, %v30_v6 }
   0xb   :  { %236 = vmatpush3.bf16.msra.mxu1 %v249_v8 }
   0xc   :  { %237 = vmatprep.subr.bf16.mxu1 %v251_v0 }
   0xf   :  { %238 = vmatpush3.bf16.msra.mxu1 %v250_v9 }
  0xca   :  { %v92_v11 = vpop.f32.mrf.mxu0 }
  0xcb   :  { %v93_v13 = vadd.f32 %v205_v10, %v92_v11 }
  0xcc   :  { %v229_v12 = vpop.f32.mrf.mxu0 }
  0xcd   :  { %v99_v17 = vmax.f32 %v93_v13, 0.0 }
  0xce   :  { %v95_v14 = vpop.f32.mrf.mxu0 }
  0xcf   :  { %v96_v15 = vadd.f32 %v205_v10, %v95_v14 }
  0xd0   :  { %v230_v16 = vpop.f32.mrf.mxu0 }
  0xd1   :  { %v100_v18 = vmax.f32 %v96_v15, 0.0 }
  0xd3   :  { %v103_v19 = vpack.c.bf16 %v100_v18, %v99_v17 }
  0xd5   :  { %240 = vmatmul.mubr.msk.bf16.vlgmr.msra.gmra.mxu1 %vm136_vm2, %v103_v19 }
 0x195   :  { %v174_v21 = vpop.f32.mrf.mxu1 }
 0x196   :  { %v181_v22 = vadd.f32 %v174_v21, %v101_v20 }
 0x197   :  { %v241_v23 = vpop.f32.mrf.mxu1 }
 0x198   :  { %183 = vst.msk [vmem:[#allocation2] sm:$0xff] %vm25_vm0, %v181_v22 }
 0x199   :  { %v177_v25 = vpop.f32.mrf.mxu1 }
 0x19a   :  { %v182_v26 = vadd.f32 %v177_v25, %v102_v24 }
 0x19b   :  { %v242_v27 = vpop.f32.mrf.mxu1 }
 0x19c   :  { %184 = vst.msk [vmem:[#allocation2 + $0x8] sm:$0xff] %vm25_vm0, %v182_v26 }
 0x19f   :  { %v188_v29 = vld [vmem:[#allocation2] sm:$0xff] }
 0x1a0   :  { %v197_v30 = vadd.f32 %v214_v28, %v188_v29 }
 0x1a2   :  { %199 = vst.msk [vmem:[%s331_s5] sm:$0xff] %vm25_vm0, %v197_v30 }
 0x1a3   :  { %v189_v31 = vld [vmem:[#allocation2 + $0x8] sm:$0xff] }
 0x1a4   :  { %v198_v32 = vadd.f32 %v214_v28, %v189_v31 }
 0x1a6   :  { %200 = vst.msk [vmem:[%s331_s5 + $0x8] sm:$0xff] %vm25_vm0, %v198_v32 }

// kernel: transformer_forward.69
= control target key start
LH: loop header
LB: loop body
LE: loop exit
PB: predicated region body
PF: predicated region fallthrough
CT: control target
= control target key end

     0   :  { %v169_v1 = vmov 0.0   ;;  %vm170_vm0 = vmmov 0   ;;  %vm20_vm1 = vcmask 261120   ;;  %s219_s0 = inlined_call_operand.vmem [shape: f32[16,32], index: 0, kind: input, shape index: {}]   ;;  %s220_s1 = inlined_call_operand.vmem [shape: bf16[32,32], index: 1, kind: input, shape index: {}]   ;;  %s221_s2 = inlined_call_operand.vmem [shape: f32[1,32], index: 2, kind: input, shape index: {}]   ;;  %s222_s3 = inlined_call_operand.hbm [shape: f32[16,32], index: 3, kind: output, shape index: {}]  }
   0x1   :  { %v145_v0 = vld [vmem:[%s220_s1 + $0x8] sm:$0xff]   ;;  %132 = vmatprep.subr.bf16.mxu0 %v169_v1  ;;  %v146_v2 = vld [vmem:[%s220_s1] sm:$0xff]   ;;  %136 = vmatprep.mubr.msk.bf16.mxu0 %vm170_vm0, %v169_v1 }
   0x2   :  { %133 = vmatpush3.bf16.msra.mxu0 %v145_v0  ;;  %v25_v3 = vld [vmem:[%s219_s0] sm:$0xff]  ;;  %v26_v4 = vld [vmem:[%s219_s0 + $0x8] sm:$0xff] }
   0x3   :  { %8 = vsyncpa [#allocation4], 0  ;;  %134 = vmatprep.subr.bf16.mxu0 %v169_v1  ;;  %21 = vst.msk [vmem:[#allocation2] sm:$0xff] %vm20_vm1, %v169_v1  ;;  %v27_v5 = vpack.c.bf16 %v26_v4, %v25_v3  ;;  %v128_v14 = vld [vmem:[%s221_s2] ss:$0 sm:$0xff]  ;;  %s171_s20 = smov [#allocation3]  }
   0x4   :  { %22 = vst.msk [vmem:[#allocation2 + $0x8] sm:$0xff] %vm20_vm1, %v169_v1  ;;  %s114_s21 = sshll.u32 %s171_s20, 4  ;;  %s115_s21 = int_to_ptr.vmem [resolvable:$true] %s114_s21 }
   0x5   :  { %s147_s22 = scalar_lea.vmem %s115_s21, 256  ;;  %p152_p1 = scmp.lt.s32.totalorder %s115_s21, %s115_s21 }
   0x6   :  { %135 = vmatpush3.bf16.msra.mxu0 %v146_v2  ;;  %p148_p0 = scmp.ne.s32.totalorder %s115_s21, %s147_s22  ;;  %p153_p2 = scmp.lt.s32.totalorder %s147_s22, %s147_s22 }
   0x8   :  { %p154_p3 = por %p153_p2, %p152_p1 }
   0x9   :  { %137 = vmatmul.mubr.msk.bf16.vlgmr.msra.gmra.mxu0 %vm20_vm1, %v27_v5 }
   0xa   :  { %v23_v6 = vld [vmem:[#allocation2] sm:$0xff]  ;;  %p155_p4 = pnand %p154_p3, %p148_p0 }
   0xb   :  { %v24_v10 = vld [vmem:[#allocation2 + $0x8] sm:$0xff] }
  0xc9   :  { %v82_v7 = vpop.f32.mrf.mxu0 }
  0xca   :  { %v89_v8 = vadd.f32 %v82_v7, %v23_v6 }
  0xcb   :  { %v138_v9 = vpop.f32.mrf.mxu0 }
  0xcc   :  { %91 = vst.msk [vmem:[#allocation2] sm:$0xff] %vm20_vm1, %v89_v8 }
  0xcd   :  { %v85_v11 = vpop.f32.mrf.mxu0 }
  0xce   :  { %v90_v12 = vadd.f32 %v85_v11, %v24_v10 }
  0xcf   :  { %v139_v13 = vpop.f32.mrf.mxu0 }
  0xd0   :  { %92 = vst.msk [vmem:[#allocation2 + $0x8] sm:$0xff] %vm20_vm1, %v90_v12 }
  0xd3   :  { %v96_v15 = vld [vmem:[#allocation2] sm:$0xff] }
  0xd4   :  { %v105_v16 = vadd.f32 %v128_v14, %v96_v15 }
  0xd6   :  { %107 = vst.msk [vmem:[#allocation3] sm:$0xff] %vm20_vm1, %v105_v16 }
  0xd7   :  { %v97_v17 = vld [vmem:[#allocation2 + $0x8] sm:$0xff] }
  0xd8   :  { %v106_v18 = vadd.f32 %v128_v14, %v97_v17 }
  0xda   :  { %108 = vst.msk [vmem:[#allocation3 + $0x8] sm:$0xff] %vm20_vm1, %v106_v18 }
  0xdb   :  { %158 = shalt.err (!%p155_p4)
}
  0xdc   :  { %s172_s23 = smov 128   ;;  %s173_s2 = smov 8  }
  0xdd   :  { %120 = dma.vmem_to_hbm [thread:$0]  %s115_s21, 256, %s222_s3, [#allocation4], %s172_s23, %s172_s23, %s173_s2  }
  0xde   :  { %167 = dma.done.wait [#allocation4], 256  }
  0xdf   :  { %168 = vsyncadd [#allocation4], 4294967040 }
  0xe0   :  { %124 = vsyncpa [#allocation4], 1 }

</bundles_post_ra>
